<compile_context>
chip_gen: v5e
topology: v5e:2x2
jax: 0.10.0
libtpu: 0.0.40
codegen_flags: <defaults>
</compile_context>

<pallas_src>
import functools

import jax
import jax.numpy as jnp
from jax.experimental import pallas as pl
from jax.experimental.pallas import tpu as pltpu


def _layernorm(v, w_row, b_row, eps=1e-5):
    # v: (rows, C) f32; w_row/b_row: (C,) f32
    mu = jnp.mean(v, axis=-1, keepdims=True)
    var = jnp.mean((v - mu) ** 2, axis=-1, keepdims=True)
    return (v - mu) * jax.lax.rsqrt(var + eps) * w_row + b_row


def _block_kernel(xq_ref, xkv_ref, ln1w_ref, ln1b_ref, wq_ref, wkv_ref,
                  wo_ref, bo_ref, ln2w_ref, ln2b_ref, w1_ref, b1_ref,
                  w2_ref, b2_ref, o_ref,
                  q_scr, m_scr, l_scr, acc_scr, *, n_head):
    qi = pl.program_id(1)          # query-tile index
    ki = pl.program_id(2)          # kv-tile index (reduction axis, "arbitrary")
    tq, C = xq_ref.shape
    tk = xkv_ref.shape[0]
    hs = C // n_head

    # ---- per-q-tile init: softmax running stats + cached (pre-scaled) q ----
    @pl.when(ki == 0)
    def _init():
        h1q = _layernorm(xq_ref[...].astype(jnp.float32), ln1w_ref[0], ln1b_ref[0])
        # 1/sqrt(hs) is folded into Wq at parameter-prep time.
        q = jnp.dot(h1q.astype(jnp.bfloat16), wq_ref[...],
                    preferred_element_type=jnp.float32)            # (tq, C)
        q_scr[...] = jnp.transpose(
            q.astype(jnp.bfloat16).reshape(tq, n_head, hs), (1, 0, 2))
        m_scr[...] = jnp.full(m_scr.shape, -jnp.inf, dtype=m_scr.dtype)
        l_scr[...] = jnp.zeros(l_scr.shape, dtype=l_scr.dtype)
        acc_scr[...] = jnp.zeros(acc_scr.shape, dtype=acc_scr.dtype)

    # ---- causal skip: kv tiles strictly above the diagonal contribute 0 ----
    @pl.when(ki <= qi)
    def _attend():
        h1k = _layernorm(xkv_ref[...].astype(jnp.float32), ln1w_ref[0], ln1b_ref[0])
        # fused K/V projection: one MXU pass, one f32->bf16 cast
        kv = jnp.dot(h1k.astype(jnp.bfloat16), wkv_ref[...],
                     preferred_element_type=jnp.float32).astype(jnp.bfloat16)
        k3 = jnp.transpose(kv[:, :C].reshape(tk, n_head, hs), (1, 0, 2))
        v3 = jnp.transpose(kv[:, C:].reshape(tk, n_head, hs), (1, 0, 2))

        s = jnp.einsum("hqd,hkd->hqk", q_scr[...], k3,
                       preferred_element_type=jnp.float32)          # (h, tq, tk) f32

        def online_softmax_update(scores):
            m_prev = m_scr[...]
            m_new = jnp.maximum(m_prev, jnp.max(scores, axis=-1, keepdims=True))
            alpha = jnp.exp(m_prev - m_new)
            p = jnp.exp(scores - m_new)                              # un-normalized
            l_scr[...] = alpha * l_scr[...] + jnp.sum(p, axis=-1, keepdims=True)
            acc_scr[...] = alpha * acc_scr[...] + jnp.einsum(
                "hqk,hkd->hqd", p.astype(jnp.bfloat16), v3,
                preferred_element_type=jnp.float32)
            m_scr[...] = m_new

        @pl.when(ki == qi)       # diagonal tile: build the causal mask (only here)
        def _diag():
            row = jax.lax.broadcasted_iota(jnp.int32, (tq, tk), 0)
            col = jax.lax.broadcasted_iota(jnp.int32, (tq, tk), 1)
            bias = jnp.where(row >= col, 0.0, -1e30).astype(jnp.float32)  # keep f32
            online_softmax_update(s + bias[None])

        @pl.when(ki < qi)        # fully-visible tile: no mask work at all
        def _full():
            online_softmax_update(s)

    # ---- diag tile is the last contributing kv step: finalize + FFN ----
    @pl.when(ki == qi)
    def _finalize():
        inv_l = pl.reciprocal(l_scr[...], approx=True)   # EUP; deferred normalization
        ctx = (acc_scr[...] * inv_l).astype(jnp.bfloat16)            # (h, tq, hs)
        attn = jnp.transpose(ctx, (1, 0, 2)).reshape(tq, C)          # once per q tile
        proj = jnp.dot(attn, wo_ref[...],
                       preferred_element_type=jnp.float32) + bo_ref[0]
        x1 = xq_ref[...].astype(jnp.float32) + proj                  # residual 1 (f32)

        h2 = _layernorm(x1, ln2w_ref[0], ln2b_ref[0])
        ff = jnp.dot(h2.astype(jnp.bfloat16), w1_ref[...],
                     preferred_element_type=jnp.float32) + b1_ref[0]
        ff = jnp.maximum(ff, 0.0)
        ff = jnp.dot(ff.astype(jnp.bfloat16), w2_ref[...],
                     preferred_element_type=jnp.float32) + b2_ref[0]
        o_ref[...] = (x1 + ff).astype(o_ref.dtype)                   # residual 2


def prepare_block_params(params, n_head):
    """One-time parameter prep (call once, outside the forward path)."""
    (ln1w, ln1b, wq, wk, wv, wo, bo, ln2w, ln2b, w1, b1, w2, b2) = params
    C = wq.shape[0]
    hs = C // n_head
    scale = float(hs) ** -0.5
    wq_s = (wq * scale).astype(jnp.bfloat16)                    # fold 1/sqrt(hs) into Wq
    wkv = jnp.concatenate([wk, wv], axis=1).astype(jnp.bfloat16)  # fused K/V (C, 2C)
    return (ln1w, ln1b, wq_s, wkv, wo.astype(jnp.bfloat16), bo,
            ln2w, ln2b, w1.astype(jnp.bfloat16), b1,
            w2.astype(jnp.bfloat16), b2)


def transformer_block(x, prepped, n_head, *, tq=None):
    (ln1w, ln1b, wq_s, wkv, wo_b, bo, ln2w, ln2b, w1_b, b1, w2_b, b2) = prepped
    B, T, C = x.shape
    H = w1_b.shape[1]
    if tq is None:
        tq = min(T, 128)
    tk = tq                                     # causal-skip logic assumes tq == tk
    assert T % tq == 0 and C % n_head == 0
    nT = T // tq
    hs = C // n_head

    def rep(shape):                             # index-invariant (weight) operand
        return pl.BlockSpec(shape, lambda b, qi, ki: (0, 0))

    in_specs = [
        pl.BlockSpec((None, tq, C), lambda b, qi, ki: (b, qi, 0)),   # x, q rows
        pl.BlockSpec((None, tk, C), lambda b, qi, ki: (b, ki, 0)),   # x, kv rows
        rep((1, C)), rep((1, C)),               # ln1 w / b
        rep((C, C)),                            # Wq (bf16, scale folded)
        rep((C, 2 * C)),                        # Wkv (bf16, fused)
        rep((C, C)), rep((1, C)),               # Wo (bf16), bo
        rep((1, C)), rep((1, C)),               # ln2 w / b
        rep((C, H)), rep((1, H)),               # W1 (bf16), b1
        rep((H, C)), rep((1, C)),               # W2 (bf16), b2
    ]
    out_spec = pl.BlockSpec((None, tq, C), lambda b, qi, ki: (b, qi, 0))

    kernel = functools.partial(_block_kernel, n_head=n_head)
    return pl.pallas_call(
        kernel,
        out_shape=jax.ShapeDtypeStruct((B, T, C), x.dtype),
        grid_spec=pltpu.PrefetchScalarGridSpec(
            num_scalar_prefetch=0,
            grid=(B, nT, nT),                   # kv (reduction) axis last
            in_specs=in_specs,
            out_specs=out_spec,
            scratch_shapes=[
                pltpu.VMEM((n_head, tq, hs), jnp.bfloat16),   # cached q tile
                pltpu.VMEM((n_head, tq, 1), jnp.float32),     # running max m
                pltpu.VMEM((n_head, tq, 1), jnp.float32),     # running denom l
                pltpu.VMEM((n_head, tq, hs), jnp.float32),    # running numerator
            ]),
        compiler_params=pltpu.CompilerParams(
            dimension_semantics=("parallel", "parallel", "arbitrary"),
            vmem_limit_bytes=64 * 1024 * 1024),
    )(x, x, ln1w, ln1b, wq_s, wkv, wo_b, bo, ln2w, ln2b, w1_b, b1, w2_b, b2)


def _reference_block(x, params, n_head):
    """Pure-JAX f32 reference with identical math, for correctness checking."""
    (ln1w, ln1b, wq, wk, wv, wo, bo, ln2w, ln2b, w1, b1, w2, b2) = params
    B, T, C = x.shape
    hs = C // n_head

    def ln(v, w, b):
        mu = jnp.mean(v, axis=-1, keepdims=True)
        var = jnp.mean((v - mu) ** 2, axis=-1, keepdims=True)
        return (v - mu) * jax.lax.rsqrt(var + 1e-5) * w[0] + b[0]

    h1 = ln(x, ln1w, ln1b)
    q = (h1 @ wq).reshape(B, T, n_head, hs).transpose(0, 2, 1, 3)
    k = (h1 @ wk).reshape(B, T, n_head, hs).transpose(0, 2, 1, 3)
    v = (h1 @ wv).reshape(B, T, n_head, hs).transpose(0, 2, 1, 3)
    scores = jnp.einsum("bhqd,bhkd->bhqk", q, k) * (hs ** -0.5)
    mask = jnp.tril(jnp.ones((T, T), dtype=bool))
    scores = jnp.where(mask, scores, -1e30)
    p = jax.nn.softmax(scores, axis=-1)
    attn = jnp.einsum("bhqk,bhkd->bhqd", p, v).transpose(0, 2, 1, 3).reshape(B, T, C)
    x1 = x + attn @ wo + bo[0]
    h2 = ln(x1, ln2w, ln2b)
    ff = jax.nn.relu(h2 @ w1 + b1[0]) @ w2 + b2[0]
    return x1 + ff


if __name__ == "__main__":
    # Small shapes consistent with the module: B=2, T=block_size=16, C=n_embd=32,
    # n_head=4, FFN hidden = 4*C.  tq=8 so the flash tiling / causal-skip /
    # online-softmax multi-step path is actually exercised (grid = (2, 2, 2)).
    B, T, C, n_head = 2, 16, 32, 4
    H = 4 * C

    key = jax.random.PRNGKey(0)
    keys = jax.random.split(key, 10)
    scale = 0.02

    x = jax.random.normal(keys[0], (B, T, C), dtype=jnp.float32)

    ln1w = jnp.ones((1, C), jnp.float32)
    ln1b = jnp.zeros((1, C), jnp.float32)
    wq = scale * jax.random.normal(keys[1], (C, C), jnp.float32)
    wk = scale * jax.random.normal(keys[2], (C, C), jnp.float32)
    wv = scale * jax.random.normal(keys[3], (C, C), jnp.float32)
    wo = scale * jax.random.normal(keys[4], (C, C), jnp.float32)
    bo = jnp.zeros((1, C), jnp.float32)
    ln2w = jnp.ones((1, C), jnp.float32)
    ln2b = jnp.zeros((1, C), jnp.float32)
    w1 = scale * jax.random.normal(keys[5], (C, H), jnp.float32)
    b1 = jnp.zeros((1, H), jnp.float32)
    w2 = scale * jax.random.normal(keys[6], (H, C), jnp.float32)
    b2 = jnp.zeros((1, C), jnp.float32)

    params = (ln1w, ln1b, wq, wk, wv, wo, bo, ln2w, ln2b, w1, b1, w2, b2)

    # One-time parameter prep (fused/bf16/scaled weights), then the forward.
    prepped = prepare_block_params(params, n_head)
    out = transformer_block(x, prepped, n_head, tq=8)
    out = jax.block_until_ready(out)

    ref = _reference_block(x, params, n_head)
    assert out.shape == (B, T, C)
    # bf16 MXU operands + approx reciprocal -> compare against f32 reference
    # with a correspondingly loosened (but still tight) tolerance.
    assert jnp.allclose(out, ref, atol=5e-3, rtol=5e-3), "mismatch vs pure-JAX reference"

    print("KERNEL_OK")
</pallas_src>

<mosaic_0001>
module attributes {stable_mosaic.version = 11 : i64} {
  func.func @_block_kernel(%arg0: i32, %arg1: i32, %arg2: i32, %arg3: memref<1x8x32xf32, #tpu.memory_space<vmem>>, %arg4: memref<1x8x32xf32, #tpu.memory_space<vmem>>, %arg5: memref<1x32xf32, #tpu.memory_space<vmem>>, %arg6: memref<1x32xf32, #tpu.memory_space<vmem>>, %arg7: memref<32x32xbf16, #tpu.memory_space<vmem>>, %arg8: memref<32x64xbf16, #tpu.memory_space<vmem>>, %arg9: memref<32x32xbf16, #tpu.memory_space<vmem>>, %arg10: memref<1x32xf32, #tpu.memory_space<vmem>>, %arg11: memref<1x32xf32, #tpu.memory_space<vmem>>, %arg12: memref<1x32xf32, #tpu.memory_space<vmem>>, %arg13: memref<32x128xbf16, #tpu.memory_space<vmem>>, %arg14: memref<1x128xf32, #tpu.memory_space<vmem>>, %arg15: memref<128x32xbf16, #tpu.memory_space<vmem>>, %arg16: memref<1x32xf32, #tpu.memory_space<vmem>>, %arg17: memref<1x8x32xf32, #tpu.memory_space<vmem>>, %arg18: memref<4x8x8xbf16, #tpu.memory_space<vmem>>, %arg19: memref<4x8x1xf32, #tpu.memory_space<vmem>>, %arg20: memref<4x8x1xf32, #tpu.memory_space<vmem>>, %arg21: memref<4x8x8xf32, #tpu.memory_space<vmem>>) attributes {dimension_semantics = [#tpu.dimension_semantics<parallel>, #tpu.dimension_semantics<parallel>, #tpu.dimension_semantics<arbitrary>], iteration_bounds = array<i64: 2, 2, 2>, scalar_prefetch = 0 : i64, scratch_operands = 4 : i64, tpu.core_type = #tpu.core_type<tc>, window_params = [{transform_indices = @transform_0, window_bounds = array<i64: 1, 8, 32>}, {transform_indices = @transform_1, window_bounds = array<i64: 1, 8, 32>}, {pipeline_mode = #tpu.pipeline_mode<synchronous>, transform_indices = @transform_2, window_bounds = array<i64: 1, 32>}, {pipeline_mode = #tpu.pipeline_mode<synchronous>, transform_indices = @transform_3, window_bounds = array<i64: 1, 32>}, {pipeline_mode = #tpu.pipeline_mode<synchronous>, transform_indices = @transform_4, window_bounds = array<i64: 32, 32>}, {pipeline_mode = #tpu.pipeline_mode<synchronous>, transform_indices = @transform_5, window_bounds = array<i64: 32, 64>}, {pipeline_mode = #tpu.pipeline_mode<synchronous>, transform_indices = @transform_6, window_bounds = array<i64: 32, 32>}, {pipeline_mode = #tpu.pipeline_mode<synchronous>, transform_indices = @transform_7, window_bounds = array<i64: 1, 32>}, {pipeline_mode = #tpu.pipeline_mode<synchronous>, transform_indices = @transform_8, window_bounds = array<i64: 1, 32>}, {pipeline_mode = #tpu.pipeline_mode<synchronous>, transform_indices = @transform_9, window_bounds = array<i64: 1, 32>}, {pipeline_mode = #tpu.pipeline_mode<synchronous>, transform_indices = @transform_10, window_bounds = array<i64: 32, 128>}, {pipeline_mode = #tpu.pipeline_mode<synchronous>, transform_indices = @transform_11, window_bounds = array<i64: 1, 128>}, {pipeline_mode = #tpu.pipeline_mode<synchronous>, transform_indices = @transform_12, window_bounds = array<i64: 128, 32>}, {pipeline_mode = #tpu.pipeline_mode<synchronous>, transform_indices = @transform_13, window_bounds = array<i64: 1, 32>}, {transform_indices = @transform_14, window_bounds = array<i64: 1, 8, 32>}]} {
    %c0_i32 = arith.constant 0 : i32
    %0 = arith.cmpi eq, %arg2, %c0_i32 : i32
    %1 = arith.extui %0 : i1 to i32
    %c0_i32_0 = arith.constant 0 : i32
    %2 = arith.cmpi ne, %1, %c0_i32_0 : i32
    scf.if %2 {
      %c0 = arith.constant 0 : index
      %c0_3 = arith.constant 0 : index
      %c0_4 = arith.constant 0 : index
      %9 = vector.load %arg3[%c0, %c0_3, %c0_4] : memref<1x8x32xf32, #tpu.memory_space<vmem>>, vector<1x8x32xf32>
      %10 = vector.shape_cast %9 : vector<1x8x32xf32> to vector<8x32xf32>
      %c0_5 = arith.constant 0 : index
      %c0_6 = arith.constant 0 : index
      %11 = vector.load %arg5[%c0_5, %c0_6] : memref<1x32xf32, #tpu.memory_space<vmem>>, vector<1x32xf32>
      %12 = vector.shape_cast %11 : vector<1x32xf32> to vector<32xf32>
      %c0_7 = arith.constant 0 : index
      %c0_8 = arith.constant 0 : index
      %13 = vector.load %arg6[%c0_7, %c0_8] : memref<1x32xf32, #tpu.memory_space<vmem>>, vector<1x32xf32>
      %14 = vector.shape_cast %13 : vector<1x32xf32> to vector<32xf32>
      %cst = arith.constant dense<0.000000e+00> : vector<8xf32>
      %15 = vector.multi_reduction <add>, %10, %cst [1] : vector<8x32xf32> to vector<8xf32>
      %16 = vector.shape_cast %15 : vector<8xf32> to vector<8x1xf32>
      %cst_9 = arith.constant 3.200000e+01 : f32
      %17 = vector.broadcast %cst_9 : f32 to vector<8x1xf32>
      %18 = arith.divf %16, %17 : vector<8x1xf32>
      %19 = vector.broadcast %18 : vector<8x1xf32> to vector<8x32xf32>
      %20 = arith.subf %10, %19 : vector<8x32xf32>
      %21 = arith.mulf %20, %20 : vector<8x32xf32>
      %cst_10 = arith.constant dense<0.000000e+00> : vector<8xf32>
      %22 = vector.multi_reduction <add>, %21, %cst_10 [1] : vector<8x32xf32> to vector<8xf32>
      %23 = vector.shape_cast %22 : vector<8xf32> to vector<8x1xf32>
      %cst_11 = arith.constant 3.200000e+01 : f32
      %24 = vector.broadcast %cst_11 : f32 to vector<8x1xf32>
      %25 = arith.divf %23, %24 : vector<8x1xf32>
      %26 = vector.broadcast %18 : vector<8x1xf32> to vector<8x32xf32>
      %27 = arith.subf %10, %26 : vector<8x32xf32>
      %cst_12 = arith.constant 9.99999974E-6 : f32
      %28 = vector.broadcast %cst_12 : f32 to vector<8x1xf32>
      %29 = arith.addf %25, %28 : vector<8x1xf32>
      %30 = math.rsqrt %29 : vector<8x1xf32>
      %31 = vector.broadcast %30 : vector<8x1xf32> to vector<8x32xf32>
      %32 = arith.mulf %27, %31 : vector<8x32xf32>
      %33 = vector.shape_cast %12 : vector<32xf32> to vector<1x32xf32>
      %34 = vector.broadcast %33 : vector<1x32xf32> to vector<8x32xf32>
      %35 = arith.mulf %32, %34 : vector<8x32xf32>
      %36 = vector.shape_cast %14 : vector<32xf32> to vector<1x32xf32>
      %37 = vector.broadcast %36 : vector<1x32xf32> to vector<8x32xf32>
      %38 = arith.addf %35, %37 : vector<8x32xf32>
      %39 = arith.truncf %38 : vector<8x32xf32> to vector<8x32xbf16>
      %c0_13 = arith.constant 0 : index
      %c0_14 = arith.constant 0 : index
      %40 = vector.load %arg7[%c0_13, %c0_14] : memref<32x32xbf16, #tpu.memory_space<vmem>>, vector<32x32xbf16>
      %cst_15 = arith.constant dense<0.000000e+00> : vector<8x32xf32>
      %41 = tpu.matmul %39, %40, %cst_15 {dimension_numbers = #tpu.dot_dimension_numbers<[1], [0], [0], [1], [0, 0, 1, 1], [], []>} : vector<8x32xbf16>, vector<32x32xbf16>, vector<8x32xf32> -> vector<8x32xf32>
      %42 = arith.truncf %41 : vector<8x32xf32> to vector<8x32xbf16>
      %43 = vector.shape_cast %42 : vector<8x32xbf16> to vector<8x4x8xbf16>
      %44 = tpu.transpose %43, [1, 0, 2] : vector<8x4x8xbf16> -> vector<4x8x8xbf16>
      %c0_16 = arith.constant 0 : index
      %c0_17 = arith.constant 0 : index
      %c0_18 = arith.constant 0 : index
      %45 = vector.load %arg18[%c0_16, %c0_17, %c0_18] : memref<4x8x8xbf16, #tpu.memory_space<vmem>>, vector<4x8x8xbf16>
      tpu.vector_store %arg18[%c0_16, %c0_17, %c0_18], %44 {strides = array<i32>} : memref<4x8x8xbf16, #tpu.memory_space<vmem>>, vector<4x8x8xbf16>,
      %cst_19 = arith.constant 0xFF800000 : f32
      %46 = vector.broadcast %cst_19 : f32 to vector<4x8x1xf32>
      %c0_20 = arith.constant 0 : index
      %c0_21 = arith.constant 0 : index
      %c0_22 = arith.constant 0 : index
      %47 = vector.load %arg19[%c0_20, %c0_21, %c0_22] : memref<4x8x1xf32, #tpu.memory_space<vmem>>, vector<4x8x1xf32>
      tpu.vector_store %arg19[%c0_20, %c0_21, %c0_22], %46 {strides = array<i32>} : memref<4x8x1xf32, #tpu.memory_space<vmem>>, vector<4x8x1xf32>,
      %cst_23 = arith.constant 0.000000e+00 : f32
      %48 = vector.broadcast %cst_23 : f32 to vector<4x8x1xf32>
      %c0_24 = arith.constant 0 : index
      %c0_25 = arith.constant 0 : index
      %c0_26 = arith.constant 0 : index
      %49 = vector.load %arg20[%c0_24, %c0_25, %c0_26] : memref<4x8x1xf32, #tpu.memory_space<vmem>>, vector<4x8x1xf32>
      tpu.vector_store %arg20[%c0_24, %c0_25, %c0_26], %48 {strides = array<i32>} : memref<4x8x1xf32, #tpu.memory_space<vmem>>, vector<4x8x1xf32>,
      %cst_27 = arith.constant 0.000000e+00 : f32
      %50 = vector.broadcast %cst_27 : f32 to vector<4x8x8xf32>
      %c0_28 = arith.constant 0 : index
      %c0_29 = arith.constant 0 : index
      %c0_30 = arith.constant 0 : index
      %51 = vector.load %arg21[%c0_28, %c0_29, %c0_30] : memref<4x8x8xf32, #tpu.memory_space<vmem>>, vector<4x8x8xf32>
      tpu.vector_store %arg21[%c0_28, %c0_29, %c0_30], %50 {strides = array<i32>} : memref<4x8x8xf32, #tpu.memory_space<vmem>>, vector<4x8x8xf32>,
    } else {
    }
    %3 = arith.cmpi sle, %arg2, %arg1 : i32
    %4 = arith.extui %3 : i1 to i32
    %c0_i32_1 = arith.constant 0 : i32
    %5 = arith.cmpi ne, %4, %c0_i32_1 : i32
    scf.if %5 {
      %c0 = arith.constant 0 : index
      %c0_3 = arith.constant 0 : index
      %c0_4 = arith.constant 0 : index
      %9 = vector.load %arg4[%c0, %c0_3, %c0_4] : memref<1x8x32xf32, #tpu.memory_space<vmem>>, vector<1x8x32xf32>
      %10 = vector.shape_cast %9 : vector<1x8x32xf32> to vector<8x32xf32>
      %c0_5 = arith.constant 0 : index
      %c0_6 = arith.constant 0 : index
      %11 = vector.load %arg5[%c0_5, %c0_6] : memref<1x32xf32, #tpu.memory_space<vmem>>, vector<1x32xf32>
      %12 = vector.shape_cast %11 : vector<1x32xf32> to vector<32xf32>
      %c0_7 = arith.constant 0 : index
      %c0_8 = arith.constant 0 : index
      %13 = vector.load %arg6[%c0_7, %c0_8] : memref<1x32xf32, #tpu.memory_space<vmem>>, vector<1x32xf32>
      %14 = vector.shape_cast %13 : vector<1x32xf32> to vector<32xf32>
      %cst = arith.constant dense<0.000000e+00> : vector<8xf32>
      %15 = vector.multi_reduction <add>, %10, %cst [1] : vector<8x32xf32> to vector<8xf32>
      %16 = vector.shape_cast %15 : vector<8xf32> to vector<8x1xf32>
      %cst_9 = arith.constant 3.200000e+01 : f32
      %17 = vector.broadcast %cst_9 : f32 to vector<8x1xf32>
      %18 = arith.divf %16, %17 : vector<8x1xf32>
      %19 = vector.broadcast %18 : vector<8x1xf32> to vector<8x32xf32>
      %20 = arith.subf %10, %19 : vector<8x32xf32>
      %21 = arith.mulf %20, %20 : vector<8x32xf32>
      %cst_10 = arith.constant dense<0.000000e+00> : vector<8xf32>
      %22 = vector.multi_reduction <add>, %21, %cst_10 [1] : vector<8x32xf32> to vector<8xf32>
      %23 = vector.shape_cast %22 : vector<8xf32> to vector<8x1xf32>
      %cst_11 = arith.constant 3.200000e+01 : f32
      %24 = vector.broadcast %cst_11 : f32 to vector<8x1xf32>
      %25 = arith.divf %23, %24 : vector<8x1xf32>
      %26 = vector.broadcast %18 : vector<8x1xf32> to vector<8x32xf32>
      %27 = arith.subf %10, %26 : vector<8x32xf32>
      %cst_12 = arith.constant 9.99999974E-6 : f32
      %28 = vector.broadcast %cst_12 : f32 to vector<8x1xf32>
      %29 = arith.addf %25, %28 : vector<8x1xf32>
      %30 = math.rsqrt %29 : vector<8x1xf32>
      %31 = vector.broadcast %30 : vector<8x1xf32> to vector<8x32xf32>
      %32 = arith.mulf %27, %31 : vector<8x32xf32>
      %33 = vector.shape_cast %12 : vector<32xf32> to vector<1x32xf32>
      %34 = vector.broadcast %33 : vector<1x32xf32> to vector<8x32xf32>
      %35 = arith.mulf %32, %34 : vector<8x32xf32>
      %36 = vector.shape_cast %14 : vector<32xf32> to vector<1x32xf32>
      %37 = vector.broadcast %36 : vector<1x32xf32> to vector<8x32xf32>
      %38 = arith.addf %35, %37 : vector<8x32xf32>
      %39 = arith.truncf %38 : vector<8x32xf32> to vector<8x32xbf16>
      %c0_13 = arith.constant 0 : index
      %c0_14 = arith.constant 0 : index
      %40 = vector.load %arg8[%c0_13, %c0_14] : memref<32x64xbf16, #tpu.memory_space<vmem>>, vector<32x64xbf16>
      %cst_15 = arith.constant dense<0.000000e+00> : vector<8x64xf32>
      %41 = tpu.matmul %39, %40, %cst_15 {dimension_numbers = #tpu.dot_dimension_numbers<[1], [0], [0], [1], [0, 0, 1, 1], [], []>} : vector<8x32xbf16>, vector<32x64xbf16>, vector<8x64xf32> -> vector<8x64xf32>
      %42 = arith.truncf %41 : vector<8x64xf32> to vector<8x64xbf16>
      %43 = vector.extract_strided_slice %42 {offsets = [0, 0], sizes = [8, 32], strides = [1, 1]} : vector<8x64xbf16> to vector<8x32xbf16>
      %44 = vector.shape_cast %43 : vector<8x32xbf16> to vector<8x4x8xbf16>
      %45 = tpu.transpose %44, [1, 0, 2] : vector<8x4x8xbf16> -> vector<4x8x8xbf16>
      %46 = vector.extract_strided_slice %42 {offsets = [0, 32], sizes = [8, 32], strides = [1, 1]} : vector<8x64xbf16> to vector<8x32xbf16>
      %47 = vector.shape_cast %46 : vector<8x32xbf16> to vector<8x4x8xbf16>
      %48 = tpu.transpose %47, [1, 0, 2] : vector<8x4x8xbf16> -> vector<4x8x8xbf16>
      %c0_16 = arith.constant 0 : index
      %c0_17 = arith.constant 0 : index
      %c0_18 = arith.constant 0 : index
      %49 = vector.load %arg18[%c0_16, %c0_17, %c0_18] : memref<4x8x8xbf16, #tpu.memory_space<vmem>>, vector<4x8x8xbf16>
      "tpu.trace_start"() <{level = 10 : i32, message = "hqd,hkd->hqk"}> : () -> ()
      %cst_19 = arith.constant dense<0.000000e+00> : vector<4x8x8xf32>
      %50 = tpu.matmul %49, %45, %cst_19 {dimension_numbers = #tpu.dot_dimension_numbers<[2], [2], [1], [1], [0, 0, 0, 1, 1, 1], [0], [0]>} : vector<4x8x8xbf16>, vector<4x8x8xbf16>, vector<4x8x8xf32> -> vector<4x8x8xf32>
      "tpu.trace_stop"() : () -> ()
      %51 = arith.cmpi eq, %arg2, %arg1 : i32
      %52 = arith.extui %51 : i1 to i32
      %c0_i32_20 = arith.constant 0 : i32
      %53 = arith.cmpi ne, %52, %c0_i32_20 : i32
      scf.if %53 {
        %57 = tpu.iota {dimensions = array<i32: 0>} : vector<8x8xi32>
        %58 = tpu.iota {dimensions = array<i32: 1>} : vector<8x8xi32>
        %59 = arith.cmpi sge, %57, %58 : vector<8x8xi32>
        %cst_22 = arith.constant 0.000000e+00 : f32
        %cst_23 = arith.constant -1.000000e+30 : f32
        %60 = vector.broadcast %cst_22 : f32 to vector<8x8xf32>
        %61 = vector.broadcast %cst_23 : f32 to vector<8x8xf32>
        %62 = arith.select %59, %60, %61 : vector<8x8xi1>, vector<8x8xf32>
        %63 = vector.shape_cast %62 : vector<8x8xf32> to vector<1x8x8xf32>
        %64 = vector.broadcast %63 : vector<1x8x8xf32> to vector<4x8x8xf32>
        %65 = arith.addf %50, %64 : vector<4x8x8xf32>
        %c0_24 = arith.constant 0 : index
        %c0_25 = arith.constant 0 : index
        %c0_26 = arith.constant 0 : index
        %66 = vector.load %arg19[%c0_24, %c0_25, %c0_26] : memref<4x8x1xf32, #tpu.memory_space<vmem>>, vector<4x8x1xf32>
        %cst_27 = arith.constant dense<0xFF800000> : vector<4x8xf32>
        %67 = vector.multi_reduction <maximumf>, %65, %cst_27 [2] : vector<4x8x8xf32> to vector<4x8xf32>
        %68 = vector.shape_cast %67 : vector<4x8xf32> to vector<4x8x1xf32>
        %69 = arith.maximumf %66, %68 : vector<4x8x1xf32>
        %70 = arith.subf %66, %69 : vector<4x8x1xf32>
        %71 = math.exp %70 : vector<4x8x1xf32>
        %72 = vector.broadcast %69 : vector<4x8x1xf32> to vector<4x8x8xf32>
        %73 = arith.subf %65, %72 : vector<4x8x8xf32>
        %74 = math.exp %73 : vector<4x8x8xf32>
        %c0_28 = arith.constant 0 : index
        %c0_29 = arith.constant 0 : index
        %c0_30 = arith.constant 0 : index
        %75 = vector.load %arg20[%c0_28, %c0_29, %c0_30] : memref<4x8x1xf32, #tpu.memory_space<vmem>>, vector<4x8x1xf32>
        %76 = arith.mulf %71, %75 : vector<4x8x1xf32>
        %cst_31 = arith.constant dense<0.000000e+00> : vector<4x8xf32>
        %77 = vector.multi_reduction <add>, %74, %cst_31 [2] : vector<4x8x8xf32> to vector<4x8xf32>
        %78 = vector.shape_cast %77 : vector<4x8xf32> to vector<4x8x1xf32>
        %79 = arith.addf %76, %78 : vector<4x8x1xf32>
        %c0_32 = arith.constant 0 : index
        %c0_33 = arith.constant 0 : index
        %c0_34 = arith.constant 0 : index
        %80 = vector.load %arg20[%c0_32, %c0_33, %c0_34] : memref<4x8x1xf32, #tpu.memory_space<vmem>>, vector<4x8x1xf32>
        tpu.vector_store %arg20[%c0_32, %c0_33, %c0_34], %79 {strides = array<i32>} : memref<4x8x1xf32, #tpu.memory_space<vmem>>, vector<4x8x1xf32>,
        %c0_35 = arith.constant 0 : index
        %c0_36 = arith.constant 0 : index
        %c0_37 = arith.constant 0 : index
        %81 = vector.load %arg21[%c0_35, %c0_36, %c0_37] : memref<4x8x8xf32, #tpu.memory_space<vmem>>, vector<4x8x8xf32>
        %82 = vector.broadcast %71 : vector<4x8x1xf32> to vector<4x8x8xf32>
        %83 = arith.mulf %82, %81 : vector<4x8x8xf32>
        %84 = arith.truncf %74 : vector<4x8x8xf32> to vector<4x8x8xbf16>
        "tpu.trace_start"() <{level = 10 : i32, message = "hqk,hkd->hqd"}> : () -> ()
        %cst_38 = arith.constant dense<0.000000e+00> : vector<4x8x8xf32>
        %85 = tpu.matmul %84, %48, %cst_38 {dimension_numbers = #tpu.dot_dimension_numbers<[2], [1], [1], [2], [0, 0, 0, 1, 1, 2], [0], [0]>} : vector<4x8x8xbf16>, vector<4x8x8xbf16>, vector<4x8x8xf32> -> vector<4x8x8xf32>
        "tpu.trace_stop"() : () -> ()
        %86 = arith.addf %83, %85 : vector<4x8x8xf32>
        %c0_39 = arith.constant 0 : index
        %c0_40 = arith.constant 0 : index
        %c0_41 = arith.constant 0 : index
        %87 = vector.load %arg21[%c0_39, %c0_40, %c0_41] : memref<4x8x8xf32, #tpu.memory_space<vmem>>, vector<4x8x8xf32>
        tpu.vector_store %arg21[%c0_39, %c0_40, %c0_41], %86 {strides = array<i32>} : memref<4x8x8xf32, #tpu.memory_space<vmem>>, vector<4x8x8xf32>,
        %c0_42 = arith.constant 0 : index
        %c0_43 = arith.constant 0 : index
        %c0_44 = arith.constant 0 : index
        %88 = vector.load %arg19[%c0_42, %c0_43, %c0_44] : memref<4x8x1xf32, #tpu.memory_space<vmem>>, vector<4x8x1xf32>
        tpu.vector_store %arg19[%c0_42, %c0_43, %c0_44], %69 {strides = array<i32>} : memref<4x8x1xf32, #tpu.memory_space<vmem>>, vector<4x8x1xf32>,
      } else {
      }
      %54 = arith.cmpi slt, %arg2, %arg1 : i32
      %55 = arith.extui %54 : i1 to i32
      %c0_i32_21 = arith.constant 0 : i32
      %56 = arith.cmpi ne, %55, %c0_i32_21 : i32
      scf.if %56 {
        %c0_22 = arith.constant 0 : index
        %c0_23 = arith.constant 0 : index
        %c0_24 = arith.constant 0 : index
        %57 = vector.load %arg19[%c0_22, %c0_23, %c0_24] : memref<4x8x1xf32, #tpu.memory_space<vmem>>, vector<4x8x1xf32>
        %cst_25 = arith.constant dense<0xFF800000> : vector<4x8xf32>
        %58 = vector.multi_reduction <maximumf>, %50, %cst_25 [2] : vector<4x8x8xf32> to vector<4x8xf32>
        %59 = vector.shape_cast %58 : vector<4x8xf32> to vector<4x8x1xf32>
        %60 = arith.maximumf %57, %59 : vector<4x8x1xf32>
        %61 = arith.subf %57, %60 : vector<4x8x1xf32>
        %62 = math.exp %61 : vector<4x8x1xf32>
        %63 = vector.broadcast %60 : vector<4x8x1xf32> to vector<4x8x8xf32>
        %64 = arith.subf %50, %63 : vector<4x8x8xf32>
        %65 = math.exp %64 : vector<4x8x8xf32>
        %c0_26 = arith.constant 0 : index
        %c0_27 = arith.constant 0 : index
        %c0_28 = arith.constant 0 : index
        %66 = vector.load %arg20[%c0_26, %c0_27, %c0_28] : memref<4x8x1xf32, #tpu.memory_space<vmem>>, vector<4x8x1xf32>
        %67 = arith.mulf %62, %66 : vector<4x8x1xf32>
        %cst_29 = arith.constant dense<0.000000e+00> : vector<4x8xf32>
        %68 = vector.multi_reduction <add>, %65, %cst_29 [2] : vector<4x8x8xf32> to vector<4x8xf32>
        %69 = vector.shape_cast %68 : vector<4x8xf32> to vector<4x8x1xf32>
        %70 = arith.addf %67, %69 : vector<4x8x1xf32>
        %c0_30 = arith.constant 0 : index
        %c0_31 = arith.constant 0 : index
        %c0_32 = arith.constant 0 : index
        %71 = vector.load %arg20[%c0_30, %c0_31, %c0_32] : memref<4x8x1xf32, #tpu.memory_space<vmem>>, vector<4x8x1xf32>
        tpu.vector_store %arg20[%c0_30, %c0_31, %c0_32], %70 {strides = array<i32>} : memref<4x8x1xf32, #tpu.memory_space<vmem>>, vector<4x8x1xf32>,
        %c0_33 = arith.constant 0 : index
        %c0_34 = arith.constant 0 : index
        %c0_35 = arith.constant 0 : index
        %72 = vector.load %arg21[%c0_33, %c0_34, %c0_35] : memref<4x8x8xf32, #tpu.memory_space<vmem>>, vector<4x8x8xf32>
        %73 = vector.broadcast %62 : vector<4x8x1xf32> to vector<4x8x8xf32>
        %74 = arith.mulf %73, %72 : vector<4x8x8xf32>
        %75 = arith.truncf %65 : vector<4x8x8xf32> to vector<4x8x8xbf16>
        "tpu.trace_start"() <{level = 10 : i32, message = "hqk,hkd->hqd"}> : () -> ()
        %cst_36 = arith.constant dense<0.000000e+00> : vector<4x8x8xf32>
        %76 = tpu.matmul %75, %48, %cst_36 {dimension_numbers = #tpu.dot_dimension_numbers<[2], [1], [1], [2], [0, 0, 0, 1, 1, 2], [0], [0]>} : vector<4x8x8xbf16>, vector<4x8x8xbf16>, vector<4x8x8xf32> -> vector<4x8x8xf32>
        "tpu.trace_stop"() : () -> ()
        %77 = arith.addf %74, %76 : vector<4x8x8xf32>
        %c0_37 = arith.constant 0 : index
        %c0_38 = arith.constant 0 : index
        %c0_39 = arith.constant 0 : index
        %78 = vector.load %arg21[%c0_37, %c0_38, %c0_39] : memref<4x8x8xf32, #tpu.memory_space<vmem>>, vector<4x8x8xf32>
        tpu.vector_store %arg21[%c0_37, %c0_38, %c0_39], %77 {strides = array<i32>} : memref<4x8x8xf32, #tpu.memory_space<vmem>>, vector<4x8x8xf32>,
        %c0_40 = arith.constant 0 : index
        %c0_41 = arith.constant 0 : index
        %c0_42 = arith.constant 0 : index
        %79 = vector.load %arg19[%c0_40, %c0_41, %c0_42] : memref<4x8x1xf32, #tpu.memory_space<vmem>>, vector<4x8x1xf32>
        tpu.vector_store %arg19[%c0_40, %c0_41, %c0_42], %60 {strides = array<i32>} : memref<4x8x1xf32, #tpu.memory_space<vmem>>, vector<4x8x1xf32>,
      } else {
      }
    } else {
    }
    %6 = arith.cmpi eq, %arg2, %arg1 : i32
    %7 = arith.extui %6 : i1 to i32
    %c0_i32_2 = arith.constant 0 : i32
    %8 = arith.cmpi ne, %7, %c0_i32_2 : i32
    scf.if %8 {
      %c0 = arith.constant 0 : index
      %c0_3 = arith.constant 0 : index
      %c0_4 = arith.constant 0 : index
      %9 = vector.load %arg20[%c0, %c0_3, %c0_4] : memref<4x8x1xf32, #tpu.memory_space<vmem>>, vector<4x8x1xf32>
      %10 = tpu.reciprocal %9 {approx = true} : vector<4x8x1xf32> -> vector<4x8x1xf32>
      %c0_5 = arith.constant 0 : index
      %c0_6 = arith.constant 0 : index
      %c0_7 = arith.constant 0 : index
      %11 = vector.load %arg21[%c0_5, %c0_6, %c0_7] : memref<4x8x8xf32, #tpu.memory_space<vmem>>, vector<4x8x8xf32>
      %12 = vector.broadcast %10 : vector<4x8x1xf32> to vector<4x8x8xf32>
      %13 = arith.mulf %11, %12 : vector<4x8x8xf32>
      %14 = arith.truncf %13 : vector<4x8x8xf32> to vector<4x8x8xbf16>
      %15 = tpu.transpose %14, [1, 0, 2] : vector<4x8x8xbf16> -> vector<8x4x8xbf16>
      %16 = vector.shape_cast %15 : vector<8x4x8xbf16> to vector<8x32xbf16>
      %c0_8 = arith.constant 0 : index
      %c0_9 = arith.constant 0 : index
      %17 = vector.load %arg9[%c0_8, %c0_9] : memref<32x32xbf16, #tpu.memory_space<vmem>>, vector<32x32xbf16>
      %cst = arith.constant dense<0.000000e+00> : vector<8x32xf32>
      %18 = tpu.matmul %16, %17, %cst {dimension_numbers = #tpu.dot_dimension_numbers<[1], [0], [0], [1], [0, 0, 1, 1], [], []>} : vector<8x32xbf16>, vector<32x32xbf16>, vector<8x32xf32> -> vector<8x32xf32>
      %c0_10 = arith.constant 0 : index
      %c0_11 = arith.constant 0 : index
      %19 = vector.load %arg10[%c0_10, %c0_11] : memref<1x32xf32, #tpu.memory_space<vmem>>, vector<1x32xf32>
      %20 = vector.shape_cast %19 : vector<1x32xf32> to vector<32xf32>
      %21 = vector.shape_cast %20 : vector<32xf32> to vector<1x32xf32>
      %22 = vector.broadcast %21 : vector<1x32xf32> to vector<8x32xf32>
      %23 = arith.addf %18, %22 : vector<8x32xf32>
      %c0_12 = arith.constant 0 : index
      %c0_13 = arith.constant 0 : index
      %c0_14 = arith.constant 0 : index
      %24 = vector.load %arg3[%c0_12, %c0_13, %c0_14] : memref<1x8x32xf32, #tpu.memory_space<vmem>>, vector<1x8x32xf32>
      %25 = vector.shape_cast %24 : vector<1x8x32xf32> to vector<8x32xf32>
      %26 = arith.addf %25, %23 : vector<8x32xf32>
      %c0_15 = arith.constant 0 : index
      %c0_16 = arith.constant 0 : index
      %27 = vector.load %arg11[%c0_15, %c0_16] : memref<1x32xf32, #tpu.memory_space<vmem>>, vector<1x32xf32>
      %28 = vector.shape_cast %27 : vector<1x32xf32> to vector<32xf32>
      %c0_17 = arith.constant 0 : index
      %c0_18 = arith.constant 0 : index
      %29 = vector.load %arg12[%c0_17, %c0_18] : memref<1x32xf32, #tpu.memory_space<vmem>>, vector<1x32xf32>
      %30 = vector.shape_cast %29 : vector<1x32xf32> to vector<32xf32>
      %cst_19 = arith.constant dense<0.000000e+00> : vector<8xf32>
      %31 = vector.multi_reduction <add>, %26, %cst_19 [1] : vector<8x32xf32> to vector<8xf32>
      %32 = vector.shape_cast %31 : vector<8xf32> to vector<8x1xf32>
      %cst_20 = arith.constant 3.200000e+01 : f32
      %33 = vector.broadcast %cst_20 : f32 to vector<8x1xf32>
      %34 = arith.divf %32, %33 : vector<8x1xf32>
      %35 = vector.broadcast %34 : vector<8x1xf32> to vector<8x32xf32>
      %36 = arith.subf %26, %35 : vector<8x32xf32>
      %37 = arith.mulf %36, %36 : vector<8x32xf32>
      %cst_21 = arith.constant dense<0.000000e+00> : vector<8xf32>
      %38 = vector.multi_reduction <add>, %37, %cst_21 [1] : vector<8x32xf32> to vector<8xf32>
      %39 = vector.shape_cast %38 : vector<8xf32> to vector<8x1xf32>
      %cst_22 = arith.constant 3.200000e+01 : f32
      %40 = vector.broadcast %cst_22 : f32 to vector<8x1xf32>
      %41 = arith.divf %39, %40 : vector<8x1xf32>
      %42 = vector.broadcast %34 : vector<8x1xf32> to vector<8x32xf32>
      %43 = arith.subf %26, %42 : vector<8x32xf32>
      %cst_23 = arith.constant 9.99999974E-6 : f32
      %44 = vector.broadcast %cst_23 : f32 to vector<8x1xf32>
      %45 = arith.addf %41, %44 : vector<8x1xf32>
      %46 = math.rsqrt %45 : vector<8x1xf32>
      %47 = vector.broadcast %46 : vector<8x1xf32> to vector<8x32xf32>
      %48 = arith.mulf %43, %47 : vector<8x32xf32>
      %49 = vector.shape_cast %28 : vector<32xf32> to vector<1x32xf32>
      %50 = vector.broadcast %49 : vector<1x32xf32> to vector<8x32xf32>
      %51 = arith.mulf %48, %50 : vector<8x32xf32>
      %52 = vector.shape_cast %30 : vector<32xf32> to vector<1x32xf32>
      %53 = vector.broadcast %52 : vector<1x32xf32> to vector<8x32xf32>
      %54 = arith.addf %51, %53 : vector<8x32xf32>
      %55 = arith.truncf %54 : vector<8x32xf32> to vector<8x32xbf16>
      %c0_24 = arith.constant 0 : index
      %c0_25 = arith.constant 0 : index
      %56 = vector.load %arg13[%c0_24, %c0_25] : memref<32x128xbf16, #tpu.memory_space<vmem>>, vector<32x128xbf16>
      %cst_26 = arith.constant dense<0.000000e+00> : vector<8x128xf32>
      %57 = tpu.matmul %55, %56, %cst_26 {dimension_numbers = #tpu.dot_dimension_numbers<[1], [0], [0], [1], [0, 0, 1, 1], [], []>} : vector<8x32xbf16>, vector<32x128xbf16>, vector<8x128xf32> -> vector<8x128xf32>
      %c0_27 = arith.constant 0 : index
      %c0_28 = arith.constant 0 : index
      %58 = vector.load %arg14[%c0_27, %c0_28] : memref<1x128xf32, #tpu.memory_space<vmem>>, vector<1x128xf32>
      %59 = vector.shape_cast %58 : vector<1x128xf32> to vector<128xf32>
      %60 = vector.shape_cast %59 : vector<128xf32> to vector<1x128xf32>
      %61 = vector.broadcast %60 : vector<1x128xf32> to vector<8x128xf32>
      %62 = arith.addf %57, %61 : vector<8x128xf32>
      %cst_29 = arith.constant 0.000000e+00 : f32
      %63 = vector.broadcast %cst_29 : f32 to vector<8x128xf32>
      %64 = arith.maximumf %62, %63 : vector<8x128xf32>
      %65 = arith.truncf %64 : vector<8x128xf32> to vector<8x128xbf16>
      %c0_30 = arith.constant 0 : index
      %c0_31 = arith.constant 0 : index
      %66 = vector.load %arg15[%c0_30, %c0_31] : memref<128x32xbf16, #tpu.memory_space<vmem>>, vector<128x32xbf16>
      %cst_32 = arith.constant dense<0.000000e+00> : vector<8x32xf32>
      %67 = tpu.matmul %65, %66, %cst_32 {dimension_numbers = #tpu.dot_dimension_numbers<[1], [0], [0], [1], [0, 0, 1, 1], [], []>} : vector<8x128xbf16>, vector<128x32xbf16>, vector<8x32xf32> -> vector<8x32xf32>
      %c0_33 = arith.constant 0 : index
      %c0_34 = arith.constant 0 : index
      %68 = vector.load %arg16[%c0_33, %c0_34] : memref<1x32xf32, #tpu.memory_space<vmem>>, vector<1x32xf32>
      %69 = vector.shape_cast %68 : vector<1x32xf32> to vector<32xf32>
      %70 = vector.shape_cast %69 : vector<32xf32> to vector<1x32xf32>
      %71 = vector.broadcast %70 : vector<1x32xf32> to vector<8x32xf32>
      %72 = arith.addf %67, %71 : vector<8x32xf32>
      %73 = arith.addf %26, %72 : vector<8x32xf32>
      %c0_35 = arith.constant 0 : index
      %c0_36 = arith.constant 0 : index
      %c0_37 = arith.constant 0 : index
      %74 = vector.load %arg17[%c0_35, %c0_36, %c0_37] : memref<1x8x32xf32, #tpu.memory_space<vmem>>, vector<1x8x32xf32>
      %75 = vector.shape_cast %74 : vector<1x8x32xf32> to vector<8x32xf32>
      %76 = vector.shape_cast %73 : vector<8x32xf32> to vector<1x8x32xf32>
      tpu.vector_store %arg17[%c0_35, %c0_36, %c0_37], %76 {strides = array<i32>} : memref<1x8x32xf32, #tpu.memory_space<vmem>>, vector<1x8x32xf32>,
    } else {
    }
    return
  }
  func.func @transform_0(%arg0: i32, %arg1: i32, %arg2: i32) -> (i32, i32, i32) {
    %c0_i32 = arith.constant 0 : i32
    %c0_i32_0 = arith.constant 0 : i32
    return %arg0, %arg1, %c0_i32 : i32, i32, i32
  }
  func.func @transform_1(%arg0: i32, %arg1: i32, %arg2: i32) -> (i32, i32, i32) {
    %c0_i32 = arith.constant 0 : i32
    %c0_i32_0 = arith.constant 0 : i32
    return %arg0, %arg2, %c0_i32 : i32, i32, i32
  }
  func.func @transform_2(%arg0: i32, %arg1: i32, %arg2: i32) -> (i32, i32) {
    %c0_i32 = arith.constant 0 : i32
    %c0_i32_0 = arith.constant 0 : i32
    %c0_i32_1 = arith.constant 0 : i32
    return %c0_i32, %c0_i32_0 : i32, i32
  }
  func.func @transform_3(%arg0: i32, %arg1: i32, %arg2: i32) -> (i32, i32) {
    %c0_i32 = arith.constant 0 : i32
    %c0_i32_0 = arith.constant 0 : i32
    %c0_i32_1 = arith.constant 0 : i32
    return %c0_i32, %c0_i32_0 : i32, i32
  }
  func.func @transform_4(%arg0: i32, %arg1: i32, %arg2: i32) -> (i32, i32) {
    %c0_i32 = arith.constant 0 : i32
    %c0_i32_0 = arith.constant 0 : i32
    %c0_i32_1 = arith.constant 0 : i32
    return %c0_i32, %c0_i32_0 : i32, i32
  }
  func.func @transform_5(%arg0: i32, %arg1: i32, %arg2: i32) -> (i32, i32) {
    %c0_i32 = arith.constant 0 : i32
    %c0_i32_0 = arith.constant 0 : i32
    %c0_i32_1 = arith.constant 0 : i32
    return %c0_i32, %c0_i32_0 : i32, i32
  }
  func.func @transform_6(%arg0: i32, %arg1: i32, %arg2: i32) -> (i32, i32) {
    %c0_i32 = arith.constant 0 : i32
    %c0_i32_0 = arith.constant 0 : i32
    %c0_i32_1 = arith.constant 0 : i32
    return %c0_i32, %c0_i32_0 : i32, i32
  }
  func.func @transform_7(%arg0: i32, %arg1: i32, %arg2: i32) -> (i32, i32) {
    %c0_i32 = arith.constant 0 : i32
    %c0_i32_0 = arith.constant 0 : i32
    %c0_i32_1 = arith.constant 0 : i32
    return %c0_i32, %c0_i32_0 : i32, i32
  }
  func.func @transform_8(%arg0: i32, %arg1: i32, %arg2: i32) -> (i32, i32) {
    %c0_i32 = arith.constant 0 : i32
    %c0_i32_0 = arith.constant 0 : i32
    %c0_i32_1 = arith.constant 0 : i32
    return %c0_i32, %c0_i32_0 : i32, i32
  }
  func.func @transform_9(%arg0: i32, %arg1: i32, %arg2: i32) -> (i32, i32) {
    %c0_i32 = arith.constant 0 : i32
    %c0_i32_0 = arith.constant 0 : i32
    %c0_i32_1 = arith.constant 0 : i32
    return %c0_i32, %c0_i32_0 : i32, i32
  }
  func.func @transform_10(%arg0: i32, %arg1: i32, %arg2: i32) -> (i32, i32) {
    %c0_i32 = arith.constant 0 : i32
    %c0_i32_0 = arith.constant 0 : i32
    %c0_i32_1 = arith.constant 0 : i32
    return %c0_i32, %c0_i32_0 : i32, i32
  }
  func.func @transform_11(%arg0: i32, %arg1: i32, %arg2: i32) -> (i32, i32) {
    %c0_i32 = arith.constant 0 : i32
    %c0_i32_0 = arith.constant 0 : i32
    %c0_i32_1 = arith.constant 0 : i32
    return %c0_i32, %c0_i32_0 : i32, i32
  }
  func.func @transform_12(%arg0: i32, %arg1: i32, %arg2: i32) -> (i32, i32) {
    %c0_i32 = arith.constant 0 : i32
    %c0_i32_0 = arith.constant 0 : i32
    %c0_i32_1 = arith.constant 0 : i32
    return %c0_i32, %c0_i32_0 : i32, i32
  }
  func.func @transform_13(%arg0: i32, %arg1: i32, %arg2: i32) -> (i32, i32) {
    %c0_i32 = arith.constant 0 : i32
    %c0_i32_0 = arith.constant 0 : i32
    %c0_i32_1 = arith.constant 0 : i32
    return %c0_i32, %c0_i32_0 : i32, i32
  }
  func.func @transform_14(%arg0: i32, %arg1: i32, %arg2: i32) -> (i32, i32, i32) {
    %c0_i32 = arith.constant 0 : i32
    %c0_i32_0 = arith.constant 0 : i32
    return %arg0, %arg1, %c0_i32 : i32, i32, i32
  }
}

</mosaic_0001>

<bundles_post_ra>
// kernel: tpu_custom_call.1
= control target key start
LH: loop header
LB: loop body
LE: loop exit
PB: predicated region body
PF: predicated region fallthrough
CT: control target
= control target key end

     0   :  { %s3366_s0 = inlined_call_operand.vmem [shape: f32[2,16,32], index: 0, kind: input, shape index: {}]   ;;  %s3367_s1 = inlined_call_operand.vmem [shape: f32[2,16,32], index: 1, kind: input, shape index: {}]   ;;  %s3368_s2 = inlined_call_operand.vmem [shape: f32[1,32], index: 2, kind: input, shape index: {}]   ;;  %s3369_s3 = inlined_call_operand.vmem [shape: f32[1,32], index: 3, kind: input, shape index: {}]   ;;  %s3370_s4 = inlined_call_operand.vmem [shape: bf16[32,32], index: 4, kind: input, shape index: {}]   ;;  %s3371_s5 = inlined_call_operand.hbm [shape: bf16[32,64], index: 5, kind: input, shape index: {}]   ;;  %s3372_s6 = inlined_call_operand.hbm [shape: bf16[32,32], index: 6, kind: input, shape index: {}]   ;;  %s3373_s7 = inlined_call_operand.vmem [shape: f32[1,32], index: 7, kind: input, shape index: {}]   ;;  %s3374_s8 = inlined_call_operand.vmem [shape: f32[1,32], index: 8, kind: input, shape index: {}]   ;;  %s3375_s9 = inlined_call_operand.vmem [shape: f32[1,32], index: 9, kind: input, shape index: {}]   ;;  %s3376_s10 = inlined_call_operand.hbm [shape: bf16[32,128], index: 10, kind: input, shape index: {}]   ;;  %s3377_s11 = inlined_call_operand.vmem [shape: f32[1,128], index: 11, kind: input, shape index: {}]   ;;  %s3378_s12 = inlined_call_operand.vmem [shape: bf16[128,32], index: 12, kind: input, shape index: {}]   ;;  %s3379_s13 = inlined_call_operand.vmem [shape: f32[1,32], index: 13, kind: input, shape index: {}]   ;;  %s3380_s14 = inlined_call_operand.hbm [shape: f32[2,16,32], index: 14, kind: output, shape index: {}]  }
   0x1   :  { %3393 = sst [smem:[#allocation27_spill]] %s3372_s6 }
   0x2   :  { %3394 = sst [smem:[#allocation28_spill]] %s3374_s8 }
   0x3   :  { %3395 = sst [smem:[#allocation29_spill]] %s3375_s9 }
   0x4   :  { %3396 = sst [smem:[#allocation30_spill]] %s3377_s11 }
   0x5   :  { %3397 = sst [smem:[#allocation31_spill]] %s3379_s13 }
   0x6   :  { %3398 = sst [smem:[#allocation32_spill]] %s3380_s14 }
   0x7   :  { %19 = vsyncpa [#allocation7], 0 }
   0x8   :  { %20 = vsyncpa [#allocation10], 0 }
   0x9   :  { %21 = vsyncpa [#allocation8], 0 }
   0xa   :  { %23 = vsyncpa [#allocation8 + $0x1], 0  ;;  %s2836_s29 = smov 0   ;;  %s2838_s30 = smov 0  }
   0xb   :  { %s2840_s15 = smov 0   ;;  %s2842_s16 = smov 0  }
   0xc   :  { %s2844_s17 = smov 0   ;;  %s2846_s18 = smov 0  }
   0xd   :  { %s2848_s19 = smov 0   ;;  %s2850_s20 = smov 0  }
   0xe   :  { %s2852_s21 = smov 0   ;;  %s2854_s22 = smov 0  }
   0xf LB: > { %3399 = sst [smem:[#allocation16_spill]] %s2693_s29  ;;  %s2185_s23 = sadd.s32 4294967295, %s2729_s22   ;;  %s2729_s22 = sphi %s2854_s22, %s29_s22   ;;  %s2725_s21 = sphi %s2852_s21, %s3431_s21   ;;  %s2721_s20 = sphi %s2850_s20, %s3430_s20   ;;  %s2717_s19 = sphi %s2848_s19, %s3429_s19   ;;  %s2713_s18 = sphi %s2846_s18, %s3428_s18   ;;  %s2709_s17 = sphi %s2844_s17, %s3427_s17   ;;  %s2705_s16 = sphi %s2842_s16, %s3426_s16   ;;  %s2701_s15 = sphi %s2840_s15, %s3434_s15   ;;  %s2697_s30 = sphi %s2838_s30, %s3433_s30   ;;  %s2693_s29 = sphi %s2836_s29, %s3432_s29  }
  0x10   : > { %3400 = sst [smem:[#allocation17_spill]] %s2717_s19  ;;  %s2186_s24 = sadd.s32 4294967294, %s2729_s22  }
  0x11   : > { %3401 = sst [smem:[#allocation18_spill]] %s2721_s20  ;;  %s41_s25 = sadd.s32 1, %s2717_s19 }
  0x12   : > { %3402 = sst [smem:[#allocation19_spill]] %s2725_s21  ;;  %s44_s26 = sadd.s32 1, %s2721_s20 }
  0x13   : > { %3403 = sst [smem:[#allocation20_spill]] %s2729_s22  ;;  %p42_p0 = scmp.ge.s32.totalorder %s41_s25, 2 }
  0x14   : > { %s48_s27 = sadd.s32 1, %s2725_s21  ;;  %s365_s28 = sadd.s32 1, %s2701_s15 }
  0x15   : > { %p375_p1 = scmp.ne.s32.totalorder %s2701_s15, %s2697_s30  ;;  %s3436_s25 = smov (%p42_p0, %s41_s25), 0 }
  0x16   : > { %3404 = sst [smem:[#allocation21_spill]] %s3436_s25  ;;  %s3438_s26 = smov (!%p42_p0, %s44_s26), %s2721_s20 }
  0x17   : > { %p376_p2 = scmp.eq.s32.totalorder %s2185_s23, 7  ;;  %p381_p3 = scmp.ne.s32.totalorder %s2697_s30, %s2693_s29 }
  0x18   : > { %p46_p4 = scmp.ge.s32.totalorder %s3438_s26, 2  ;;  %p382_p5 = scmp.eq.s32.totalorder %s2186_s24, 7 }
  0x19   : > { %p2899_p6 = por %p376_p2, %p375_p1  ;;  %p2187_p7 = scmp.ge.s32.totalorder %s2729_s22, 1 }
  0x1a   : > { %s3440_s26 = smov (%p46_p4, %s3438_s26), 0  ;;  %s3442_s27 = smov (!%p46_p4, %s48_s27), %s2725_s21 }
  0x1b   : > { %s3405_s14 = scalar_select %p2899_p6, 1, 0 }
  0x1c   : > { %3407 = sst [smem:[#allocation23_spill]] %s3440_s26  ;;  %s361_s19 = ssub.s32 %s2721_s20, %s3440_s26 }
  0x1d   : > { %3406 = sst [smem:[#allocation22_spill]] %s3405_s14  ;;  %p2909_p8 = por %p382_p5, %p381_p3 }
  0x1e   : > { %p50_p9 = scmp.ge.s32.totalorder %s3442_s27, 2  ;;  %p389_p10 = scmp.lt.s32.totalorder %s2729_s22, 9 }
  0x1f   : > { %s3408_s13 = scalar_select %p2909_p8, 1, 0 }
  0x20   : > { %p2914_p11 = scmp.eq.s32.totalorder %s2185_s23, 0  ;;  %s3444_s27 = smov (%p50_p9, %s3442_s27), 0 }
  0x21   : > { %3409 = sst [smem:[#allocation24_spill]] %s3408_s13  ;;  %p2920_p12 = pnand %p2187_p7, %p389_p10 }
  0x22   : > { %3411 = sst [smem:[#allocation25_spill]] %s3444_s27  ;;  %s360_s26 = ssub.s32 %s2725_s21, %s3444_s27 }
  0x23   : > { %s362_s20 = sor.u32 %s361_s19, %s360_s26  ;;  %p2321_p13 = pneg %p2920_p12 }
  0x24   : > { %p363_p0 = scmp.eq.s32.totalorder %s362_s20, 0  ;;  %s3413_s6 = sld [smem:[#allocation27_spill]] }
  0x25   : > { %p2933_p1 = pnand %p2914_p11, %p2321_p13  ;;  %s2731_s11 = smov [#allocation9]  }
  0x26   : > { %s2938_s14 = scalar_select %p363_p0, %s2701_s15, %s365_s28  }
  0x27   : > { %s425_s27 = sshll.u32 %s2731_s11, 4  ;;  %s2732_s19 = smov 64   ;;  %s426_s27 = int_to_ptr.vmem [resolvable:$true] %s425_s27 }
  0x28   : > { %3415 = sst [smem:[#allocation26_spill]] %s2938_s14  ;;  %s2733_s20 = smov 4  }
  0x29   : > { %s409_s26 = sshll.u32 %s3371_s5, 4  ;;  %s446_s28 = sshll.u32 %s3376_s10, 4  ;;  %s410_s26 = int_to_ptr.hbm [resolvable:$true] %s409_s26  ;;  %s447_s28 = int_to_ptr.hbm [resolvable:$true] %s446_s28 }
  0x2a   : > { %s423_s23 = sshll.u32 %s3413_s6, 4  ;;  %s2734_s6 = smov [#allocation6]   ;;  %s424_s23 = int_to_ptr.hbm [resolvable:$true] %s423_s23 }
  0x2b   : > { %2327 = dma.hbm_to_vmem [thread:$0]  (!%p2933_p1), %s424_s23, 256, %s426_s27, [#allocation10], %s2732_s19, %s2732_s19, %s2733_s20  }
  0x2c   : > { %s411_s21 = sshll.u32 %s2734_s6, 4  ;;  %s2735_s11 = smov [#allocation11]   ;;  %s412_s21 = int_to_ptr.vmem [resolvable:$true] %s411_s21 }
  0x2d   : > { %2324 = dma.hbm_to_vmem [thread:$0]  (!%p2933_p1), %s410_s26, 256, %s412_s21, [#allocation7], %s2732_s19, %s2732_s19, %s2733_s20  }
  0x2e   : > { %s448_s14 = sshll.u32 %s2735_s11, 4  ;;  %495 = sbr.rel (%p2920_p12) target bundleno = 3104 (0xc20), region = 76  ;;  %s449_s14 = int_to_ptr.vmem [resolvable:$true] %s448_s14 }
  0x2f   : > { %2330 = dma.hbm_to_vmem [thread:$0]  (!%p2933_p1), %s447_s28, 256, %s449_s14, [#allocation10], %s2732_s19, %s2732_s19, %s2733_s20  }
  0x33   : > { %2680 = dma.done.wait (%p2914_p11), [#allocation7], 256  }
  0x34   : > { %2682 = vsyncadd (%p2914_p11), [#allocation7], 4294967040 }
  0x35   : > { %2684 = dma.done.wait (%p2914_p11), [#allocation10], 512  }
  0x36   : > { %2686 = vsyncadd (%p2914_p11), [#allocation10], 4294966784  ;;  %s560_s6 = sand.u32 1, %s2697_s30   ;;  %p563_p2 = scmp.lt.s32.totalorder %s2713_s18, 1 }
  0x37   : > { %s2966_s8 = sshll.u32 %s560_s6, 3  ;;  %p565_p3 = scmp.lt.s32.totalorder %s2709_s17, 1 }
  0x38   : > { %s564_s9 = scalar_select %p563_p2, %s2713_s18, 1 }
  0x39   : > { %s566_s14 = scalar_select %p565_p3, %s2709_s17, 1 }
  0x3a   : > { %s2197_s21 = sshll.u32 %s564_s9, 1  ;;  %p573_p4 = scmp.lt.s32.totalorder %s2705_s16, 1 }
  0x3b   : > { %s568_s22 = sadd.s32 %s2197_s21, %s566_s14  ;;  %s562_s11 = scalar_lea.vmem [#allocation12], %s2966_s8 }
  0x3c   : > { %s2198_s25 = sshll.u32 %s568_s22, 3  ;;  %p2201_p5 = scmp.ne.s32.totalorder %s2705_s16, 0 }
  0x3d   : > { %s2975_s23 = scalar_lea.vmem %s3366_s0, %s2198_s25  ;;  %s2739_s29 = smov (!%p2201_p5), 112  }
  0x3e   : > { %s574_s19 = scalar_select %p573_p4, %s2705_s16, 1 }
  0x3f   : > { %583 = sbr.rel (%p2201_p5) target bundleno = 620 (0x26c), region = 92 }
  0x40   : > { %s576_s20 = sadd.s32 %s2197_s21, %s574_s19 }
  0x41   : > { %s2200_s13 = sshll.u32 %s576_s20, 3  ;;  %s2737_s20 = smov (!%p2201_p5), 104  }
  0x42   : > { %s2981_s28 = scalar_lea.vmem %s3367_s1, %s2200_s13  ;;  %s2738_s13 = smov (!%p2201_p5), 120  }
  0x44   : > { %v584_v0 = vld [vmem:[%s2975_s23] sm:$0xff]  ;;  %vm587_vm0 = vcmask 261120   ;;  %v2736_v2 = vmov 32.0   ;;  %v2292_v14 = vld [vmem:[%s3370_s4 + $0x8] sm:$0xff]  ;;  %v2740_v35 = vmov 1983009808  }
  0x45   : > { %v588_v1 = vsel %vm587_vm0, %v584_v0, 0.0  ;;  %2454 = vrcp.f32 %v2736_v2  ;;  %651 = vmatpush.bf16.msra.mxu0 %v2292_v14  ;;  %v2291_v15 = vld [vmem:[%s3370_s4] sm:$0xff]  ;;  %v680_v36 = vunpack.c.l.s4 %v2740_v35  ;;  %v2741_v44 = vmov 1934713408  }
  0x46   : > { %589 = vadd.xlane.f32.xlu0 %v588_v1  ;;  %v2452_v25 = vld [vmem:[%s3368_s2] ss:$0 sm:$0xff]  ;;  %v694_v45 = vunpack.c.l.s4 %v2741_v44  ;;  %vm790_vm5 = vcmask 7168   ;;  %v2742_v47 = vmov -inf   ;;  %vm689_vm6 = vcmask 1047556  }
  0x47   : > { %v2453_v28 = vld [vmem:[%s3369_s3] ss:$0 sm:$0xff]  ;;  %v3001_v39 = vunpack.c.0.s8 %v680_v36  ;;  %791 = vst.msk [vmem:[#allocation3] sm:$0xff] %vm790_vm5, %v2742_v47  ;;  %v2743_v57 = vmov 0.0   ;;  %vm799_vm7 = vcmask 64512   ;;  %vm785_vm8 = vcmask 60416  }
  0x48   : > { %792 = vst.msk [vmem:[#allocation3 + $0x8] sm:$0xff] %vm790_vm5, %v2742_v47  ;;  %v695_v53 = vunpack.c.0.s8 %v694_v45 }
  0x49   : > { %652 = vmatpush.bf16.msra.mxu0 %v2291_v15  ;;  %793 = vst.msk [vmem:[#allocation3 + $0x10] sm:$0xff] %vm790_vm5, %v2742_v47 }
  0x4a   : > { %794 = vst.msk [vmem:[#allocation3 + $0x18] sm:$0xff] %vm790_vm5, %v2742_v47 }
  0x4b   : > { %v2455_v3 = vpop.eup %2454  ;;  %795 = vst.msk [vmem:[#allocation4] sm:$0xff] %vm790_vm5, %v2743_v57 }
  0x4c   : > { %v592_v4 = vmul.f32 32.0, %v2455_v3  ;;  %vm596_vm1 = vweird.f32 %v2455_v3  ;;  %796 = vst.msk [vmem:[#allocation4 + $0x8] sm:$0xff] %vm790_vm5, %v2743_v57 }
  0x4d   : > { %797 = vst.msk [vmem:[#allocation4 + $0x10] sm:$0xff] %vm790_vm5, %v2743_v57 }
  0x4e   : > { %v593_v5 = vsub.f32 1.0, %v592_v4  ;;  %798 = vst.msk [vmem:[#allocation4 + $0x18] sm:$0xff] %vm790_vm5, %v2743_v57 }
  0x4f   : > { %800 = vst.msk [vmem:[#allocation5] sm:$0xff] %vm799_vm7, %v2743_v57 }
  0x50   : > { %v594_v6 = vmul.f32 %v2455_v3, %v593_v5  ;;  %801 = vst.msk [vmem:[#allocation5 + $0x8] sm:$0xff] %vm799_vm7, %v2743_v57 }
  0x51   : > { %802 = vst.msk [vmem:[#allocation5 + $0x10] sm:$0xff] %vm799_vm7, %v2743_v57 }
  0x52   : > { %v595_v7 = vadd.f32 %v2455_v3, %v594_v6  ;;  %803 = vst.msk [vmem:[#allocation5 + $0x18] sm:$0xff] %vm799_vm7, %v2743_v57 }
  0x54   : > { %v597_v8 = vsel %vm596_vm1, %v2455_v3, %v595_v7 }
  0xb9   : > { %v590_v9 = vpop.xlane.xlu0 %589 }
  0xba   : > { %v598_v10 = vmul.f32 %v597_v8, %v590_v9 }
  0xbc   : > { %v599_v11 = vsub.f32 %v584_v0, %v598_v10 }
  0xbe   : > { %v600_v12 = vmul.f32 %v599_v11, %v599_v11 }
  0xc0   : > { %v601_v13 = vsel %vm587_vm0, %v600_v12, 0.0 }
  0xc1   : > { %602 = vadd.xlane.f32.xlu0 %v601_v13 }
 0x134   : > { %v603_v16 = vpop.xlane.xlu0 %602 }
 0x135   : > { %v604_v17 = vmul.f32 %v603_v16, %v597_v8 }
 0x137   : > { %v605_v18 = vadd.f32 1e-05, %v604_v17 }
 0x139   : > { %2456 = vrsqrt.f32 %v605_v18  ;;  %vm612_vm3 = vweird.f32 %v605_v18 }
 0x13f   : > { %v2457_v19 = vpop.eup %2456 }
 0x140   : > { %v607_v20 = vmul.f32 %v2457_v19, %v605_v18  ;;  %vm613_vm2 = vweird.f32 %v2457_v19 }
 0x141   : > { %vm614_vm4 = vmor %vm612_vm3, %vm613_vm2 }
 0x142   : > { %v608_v21 = vmul.f32 %v2457_v19, %v607_v20 }
 0x144   : > { %v609_v22 = vmul.f32 0.5, %v608_v21 }
 0x146   : > { %v610_v23 = vsub.f32 1.5, %v609_v22 }
 0x148   : > { %v611_v24 = vmul.f32 %v2457_v19, %v610_v23 }
 0x14a   : > { %v615_v26 = vsel %vm614_vm4, %v2457_v19, %v611_v24 }
 0x14b   : > { %v616_v27 = vmul.f32 %v615_v26, %v599_v11 }
 0x14d   : > { %v620_v29 = vmul.f32 %v2452_v25, %v616_v27 }
 0x14f   : > { %v624_v30 = vadd.f32 %v2453_v28, %v620_v29 }
 0x151   : > { %v625_v31 = vpack.c.bf16 %v624_v30, %v624_v30 }
 0x153   : > { %2210 = vmatmul.msk.bf16.vlgmr.msra.gmra.mxu0 %vm587_vm0, %v625_v31 }
 0x1d0   : > { %v654_v32 = vpop.f32.mrf.mxu0 }
 0x1d1   : > { %v658_v33 = vpack.c.bf16 %v654_v32, %v654_v32 }
 0x1d3   : > { %664 = vrot.lane.b32.xlu2 %v658_v33, %s2737_s20  ;;  %660 = vrot.lane.b32.xlu1 %v658_v33, %s2738_s13  ;;  %v669_v41 = vshrl.u32 %v658_v33, 16 }
 0x1d8   : > { %v656_v34 = vpop.f32.mrf.mxu0 }
 0x1db   : > { %662 = vrot.lane.b32.xlu1 %v658_v33, %s2739_s29 }
 0x22d   : > { %v665_v43 = vpop.permute.xlu2 %664 }
 0x22e   : > { %v676_v49 = vshrl.u32 %v665_v43, 16 }
 0x245   : > { %v661_v37 = vpop.permute.xlu1 %660 }
 0x246   : > { %v670_v38 = vshrl.u32 %v661_v37, 16  ;;  %v668_v40 = vpack.i.b16 %v661_v37, %v658_v33 }
 0x248   : > { %v671_v42 = vpack.i.b16 %v670_v38, %v669_v41  ;;  %v682_v46 = vperm.slane %v668_v40, %v3001_v39 }
 0x24a   : > { %v709_v50 = vperm.slane %v671_v42, %v3001_v39  ;;  %v691_v54 = vrot.slane %v682_v46, 4 }
 0x24c   : > { %v717_v58 = vrot.slane %v709_v50, 4 }
 0x24d   : > { %v663_v48 = vpop.permute.xlu1 %662 }
 0x24e   : > { %v674_v51 = vpack.i.b16 %v665_v43, %v663_v48  ;;  %v675_v52 = vshrl.u32 %v663_v48, 16 }
 0x250   : > { %v677_v55 = vpack.i.b16 %v676_v49, %v675_v52  ;;  %v687_v56 = vperm.slane %v674_v51, %v3001_v39 }
 0x252   : > { %v688_v59 = vrot.slane %v687_v56, 4  ;;  %v692_v60 = vsel %vm689_vm6, %v687_v56, %v691_v54  ;;  %v714_v61 = vperm.slane %v677_v55, %v3001_v39 }
 0x253   : > { %v700_v62 = vperm.slane %v692_v60, %v695_v53 }
 0x254   : > { %v690_v63 = vsel %vm689_vm6, %v688_v59, %v682_v46  ;;  %v715_v0 = vrot.slane %v714_v61, 4  ;;  %v718_v1 = vsel %vm689_vm6, %v714_v61, %v717_v58 }
 0x255   : > { %v696_v2 = vperm.slane %v690_v63, %v695_v53  ;;  %v703_v3 = vrot.slane %v700_v62, 4  ;;  %v726_v4 = vperm.slane %v718_v1, %v695_v53 }
 0x256   : > { %v716_v5 = vsel %vm689_vm6, %v715_v0, %v709_v50 }
 0x257   : > { %v701_v6 = vrot.slane %v696_v2, 4  ;;  %v704_v7 = vsel %vm689_vm6, 0, %v703_v3  ;;  %v722_v8 = vperm.slane %v716_v5, %v695_v53  ;;  %v729_v9 = vrot.slane %v726_v4, 4 }
 0x258   : > { %v736_v10 = vrot.slane %v704_v7, 4  ;;  %v731_v14 = vsel %vm689_vm6, %v703_v3, %v696_v2 }
 0x259   : > { %v702_v11 = vsel %vm689_vm6, 0, %v701_v6  ;;  %v727_v12 = vrot.slane %v722_v8, 4  ;;  %v730_v13 = vsel %vm689_vm6, 0, %v729_v9  ;;  %v750_v19 = vsel %vm689_vm6, %v729_v9, %v722_v8 }
 0x25a   : > { %v737_v15 = vsel %vm689_vm6, %v736_v10, %v702_v11  ;;  %v755_v16 = vrot.slane %v730_v13, 4  ;;  %v735_v21 = vperm.slane %v731_v14, %v3001_v39  ;;  %v754_v25 = vperm.slane %v750_v19, %v3001_v39 }
 0x25b   : > { %v728_v17 = vsel %vm689_vm6, 0, %v727_v12  ;;  %v741_v18 = vperm.slane %v737_v15, %v3001_v39 }
 0x25c   : > { %v756_v20 = vsel %vm689_vm6, %v755_v16, %v728_v17 }
 0x25d   : > { %v742_v22 = vrot.slane %v741_v18, 4  ;;  %v760_v23 = vperm.slane %v756_v20, %v3001_v39 }
 0x25f   : > { %v743_v24 = vsel %vm689_vm6, %v742_v22, %v735_v21  ;;  %v761_v26 = vrot.slane %v760_v23, 4 }
 0x260   : > { %v747_v27 = vperm.slane %v743_v24, %v695_v53 }
 0x261   : > { %v762_v28 = vsel %vm689_vm6, %v761_v26, %v754_v25 }
 0x262   : > { %v748_v29 = vrot.slane %v747_v27, 4  ;;  %v766_v30 = vperm.slane %v762_v28, %v695_v53  ;;  %v773_v31 = vshrl.u32 %v747_v27, 16 }
 0x264   : > { %v749_v32 = vsel %vm689_vm6, 0, %v748_v29  ;;  %v767_v33 = vrot.slane %v766_v30, 4  ;;  %v771_v34 = vpack.i.b16 %v766_v30, %v747_v27  ;;  %v774_v35 = vshrl.u32 %v766_v30, 16 }
 0x265   : > { %v781_v40 = vshrl.u32 %v749_v32, 16 }
 0x266   : > { %v768_v36 = vsel %vm689_vm6, 0, %v767_v33  ;;  %v775_v37 = vpack.i.b16 %v774_v35, %v773_v31  ;;  %786 = vst.msk [vmem:[#allocation2] sm:$0xf] %vm785_vm8, %v771_v34 }
 0x267   : > { %v779_v38 = vpack.i.b16 %v768_v36, %v749_v32  ;;  %v782_v39 = vshrl.u32 %v768_v36, 16 }
 0x268   : > { %787 = vst.msk [vmem:[#allocation2 + $0x4] sm:$0xf] %vm785_vm8, %v775_v37 }
 0x269   : > { %v783_v41 = vpack.i.b16 %v782_v39, %v781_v40  ;;  %788 = vst.msk [vmem:[#allocation2 + $0x8] sm:$0xf] %vm785_vm8, %v779_v38 }
 0x26b   : > { %789 = vst.msk [vmem:[#allocation2 + $0xc] sm:$0xf] %vm785_vm8, %v783_v41 }
 0x26c PF: > { %p2211_p7 = scmp.gt.s32.totalorder %s2705_s16, %s2709_s17 }
 0x26d   : > { %s2745_s21 = smov (!%p2211_p7), 104   ;;  %s2746_s22 = smov (!%p2211_p7), 120  }
 0x26e   : > { %807 = sbr.rel (%p2211_p7) target bundleno = 2117 (0x845), region = 96  ;;  %s2747_s25 = smov (!%p2211_p7), 96  }
 0x26f   : > { %s2748_s27 = smov (!%p2211_p7), 112   ;;  %p2225_p9 = scmp.ne.s32.totalorder (!%p2211_p7), %s2705_s16, %s2709_s17 }
 0x273   : > { %v808_v42 = vld [vmem:[%s2981_s28] sm:$0xff]  ;;  %vm811_vm9 = vcmask 261120   ;;  %v2744_v44 = vmov 32.0   ;;  %v2294_v56 = vld [vmem:[#allocation6 + $0x8] sm:$0xff]  ;;  %v2293_v57 = vld [vmem:[#allocation6] sm:$0xff]  ;;  %vm913_vm14 = vcmask 1047556  }
 0x274   : > { %v812_v43 = vsel %vm811_vm9, %v808_v42, 0.0  ;;  %2460 = vrcp.f32 %v2744_v44  ;;  %875 = vmatpush.bf16.msra.mxu0 %v2294_v56  ;;  %v2458_v3 = vld [vmem:[%s3368_s2] ss:$0 sm:$0xff]  ;;  %v2749_v14 = vmov 1983009808   ;;  %vm1131_vm15 = vcmask 64512  }
 0x275   : > { %813 = vadd.xlane.f32.xlu0 %v812_v43  ;;  %v2459_v6 = vld [vmem:[%s3369_s3] ss:$0 sm:$0xff]  ;;  %v904_v15 = vunpack.c.l.s4 %v2749_v14  ;;  %v2750_v22 = vmov 1934713408  }
 0x276   : > { %v918_v23 = vunpack.c.l.s4 %v2750_v22 }
 0x277   : > { %v3051_v18 = vunpack.c.0.s8 %v904_v15 }
 0x278   : > { %876 = vmatpush.bf16.msra.mxu0 %v2293_v57  ;;  %v3055_v30 = vunpack.c.0.s8 %v918_v23  ;;  %v1127_v23 = vld [vmem:[#allocation2] sm:$0xf] }
 0x27a   : > { %v2461_v45 = vpop.eup %2460 }
 0x27b   : > { %v816_v46 = vmul.f32 32.0, %v2461_v45  ;;  %vm820_vm10 = vweird.f32 %v2461_v45 }
 0x27d   : > { %v817_v47 = vsub.f32 1.0, %v816_v46 }
 0x27f   : > { %v818_v48 = vmul.f32 %v2461_v45, %v817_v47 }
 0x281   : > { %v819_v49 = vadd.f32 %v2461_v45, %v818_v48 }
 0x283   : > { %v821_v50 = vsel %vm820_vm10, %v2461_v45, %v819_v49 }
 0x2e8   : > { %v814_v51 = vpop.xlane.xlu0 %813 }
 0x2e9   : > { %v822_v52 = vmul.f32 %v821_v50, %v814_v51 }
 0x2eb   : > { %v823_v53 = vsub.f32 %v808_v42, %v822_v52 }
 0x2ed   : > { %v824_v54 = vmul.f32 %v823_v53, %v823_v53 }
 0x2ef   : > { %v825_v55 = vsel %vm811_vm9, %v824_v54, 0.0 }
 0x2f0   : > { %826 = vadd.xlane.f32.xlu0 %v825_v55 }
 0x363   : > { %v827_v58 = vpop.xlane.xlu0 %826 }
 0x364   : > { %v828_v59 = vmul.f32 %v827_v58, %v821_v50 }
 0x366   : > { %v829_v60 = vadd.f32 1e-05, %v828_v59 }
 0x368   : > { %2462 = vrsqrt.f32 %v829_v60  ;;  %vm836_vm12 = vweird.f32 %v829_v60 }
 0x36e   : > { %v2463_v61 = vpop.eup %2462 }
 0x36f   : > { %v831_v62 = vmul.f32 %v2463_v61, %v829_v60  ;;  %vm837_vm11 = vweird.f32 %v2463_v61 }
 0x370   : > { %vm838_vm13 = vmor %vm836_vm12, %vm837_vm11 }
 0x371   : > { %v832_v63 = vmul.f32 %v2463_v61, %v831_v62 }
 0x373   : > { %v833_v0 = vmul.f32 0.5, %v832_v63 }
 0x375   : > { %v834_v1 = vsub.f32 1.5, %v833_v0 }
 0x377   : > { %v835_v2 = vmul.f32 %v2463_v61, %v834_v1 }
 0x379   : > { %v839_v4 = vsel %vm838_vm13, %v2463_v61, %v835_v2 }
 0x37a   : > { %v840_v5 = vmul.f32 %v839_v4, %v823_v53 }
 0x37c   : > { %v844_v7 = vmul.f32 %v2458_v3, %v840_v5 }
 0x37e   : > { %v848_v8 = vadd.f32 %v2459_v6, %v844_v7 }
 0x380   : > { %v849_v9 = vpack.c.bf16 %v848_v8, %v848_v8 }
 0x382   : > { %2220 = vmatmul.msk.bf16.vlgmr.msra.gmra.mxu0 %vm811_vm9, %v849_v9 }
 0x3ff   : > { %v878_v10 = vpop.f32.mrf.mxu0 }
 0x400   : > { %v882_v11 = vpack.c.bf16 %v878_v10, %v878_v10 }
 0x402   : > { %888 = vrot.lane.b32.xlu2 %v882_v11, %s2745_s21  ;;  %884 = vrot.lane.b32.xlu1 %v882_v11, %s2746_s22  ;;  %v893_v20 = vshrl.u32 %v882_v11, 16 }
 0x407   : > { %v880_v12 = vpop.f32.mrf.mxu0 }
 0x40a   : > { %1005 = vrot.lane.b32.xlu2 %v882_v11, %s2747_s25  ;;  %886 = vrot.lane.b32.xlu1 %v882_v11, %s2748_s27 }
 0x45c   : > { %v889_v13 = vpop.permute.xlu2 %888 }
 0x45d   : > { %1011 = vrot.lane.b32.xlu2 %v889_v13, %s2747_s25  ;;  %v900_v26 = vshrl.u32 %v889_v13, 16 }
 0x474   : > { %v885_v16 = vpop.permute.xlu1 %884 }
 0x475   : > { %v894_v17 = vshrl.u32 %v885_v16, 16  ;;  %1007 = vrot.lane.b32.xlu0 %v885_v16, %s2747_s25  ;;  %v892_v19 = vpack.i.b16 %v885_v16, %v882_v11 }
 0x477   : > { %v895_v21 = vpack.i.b16 %v894_v17, %v893_v20  ;;  %v906_v24 = vperm.slane %v892_v19, %v3051_v18 }
 0x479   : > { %v933_v27 = vperm.slane %v895_v21, %v3051_v18  ;;  %v915_v31 = vrot.slane %v906_v24, 4 }
 0x47b   : > { %v941_v34 = vrot.slane %v933_v27, 4 }
 0x47c   : > { %v887_v25 = vpop.permute.xlu1 %886 }
 0x47d   : > { %v898_v28 = vpack.i.b16 %v889_v13, %v887_v25  ;;  %v899_v29 = vshrl.u32 %v887_v25, 16  ;;  %1009 = vrot.lane.b32.xlu1 %v887_v25, %s2747_s25  ;;  %v1129_v25 = vld [vmem:[#allocation2 + $0x8] sm:$0xf] }
 0x47f   : > { %v901_v32 = vpack.i.b16 %v900_v26, %v899_v29  ;;  %v911_v33 = vperm.slane %v898_v28, %v3051_v18  ;;  %v1130_v26 = vld [vmem:[#allocation2 + $0xc] sm:$0xf] }
 0x481   : > { %v912_v35 = vrot.slane %v911_v33, 4  ;;  %v916_v36 = vsel %vm913_vm14, %v911_v33, %v915_v31  ;;  %v938_v37 = vperm.slane %v901_v32, %v3051_v18 }
 0x482   : > { %v924_v38 = vperm.slane %v916_v36, %v3055_v30 }
 0x483   : > { %v914_v40 = vsel %vm913_vm14, %v912_v35, %v906_v24  ;;  %v939_v39 = vrot.slane %v938_v37, 4  ;;  %v942_v41 = vsel %vm913_vm14, %v938_v37, %v941_v34  ;;  %v1128_v24 = vld [vmem:[#allocation2 + $0x4] sm:$0xf] }
 0x484   : > { %v920_v42 = vperm.slane %v914_v40, %v3055_v30  ;;  %v927_v43 = vrot.slane %v924_v38, 4  ;;  %v950_v44 = vperm.slane %v942_v41, %v3055_v30 }
 0x485   : > { %v940_v45 = vsel %vm913_vm14, %v939_v39, %v933_v27  ;;  %v1006_v27 = vpop.permute.xlu2 %1005 }
 0x486   : > { %v925_v46 = vrot.slane %v920_v42, 4  ;;  %v928_v47 = vsel %vm913_vm14, 0, %v927_v43  ;;  %v946_v48 = vperm.slane %v940_v45, %v3055_v30  ;;  %v953_v49 = vrot.slane %v950_v44, 4 }
 0x487   : > { %v960_v50 = vrot.slane %v928_v47, 4  ;;  %v955_v55 = vsel %vm913_vm14, %v927_v43, %v920_v42  ;;  %v1016_v31 = vshrl.u32 %v1006_v27, 16 }
 0x488   : > { %v951_v51 = vrot.slane %v946_v48, 4  ;;  %v954_v52 = vsel %vm913_vm14, 0, %v953_v49  ;;  %v926_v53 = vsel %vm913_vm14, 0, %v925_v46  ;;  %v974_v59 = vsel %vm913_vm14, %v953_v49, %v946_v48 }
 0x489   : > { %v979_v54 = vrot.slane %v954_v52, 4  ;;  %v961_v56 = vsel %vm913_vm14, %v960_v50, %v926_v53  ;;  %v959_v61 = vperm.slane %v955_v55, %v3051_v18  ;;  %v978_v1 = vperm.slane %v974_v59, %v3051_v18 }
 0x48a   : > { %v952_v57 = vsel %vm913_vm14, 0, %v951_v51  ;;  %v965_v58 = vperm.slane %v961_v56, %v3051_v18 }
 0x48b   : > { %v980_v60 = vsel %vm913_vm14, %v979_v54, %v952_v57 }
 0x48c   : > { %v966_v62 = vrot.slane %v965_v58, 4  ;;  %v984_v63 = vperm.slane %v980_v60, %v3051_v18 }
 0x48e   : > { %v967_v0 = vsel %vm913_vm14, %v966_v62, %v959_v61  ;;  %v985_v2 = vrot.slane %v984_v63, 4 }
 0x48f   : > { %v971_v3 = vperm.slane %v967_v0, %v3055_v30 }
 0x490   : > { %v986_v4 = vsel %vm913_vm14, %v985_v2, %v978_v1 }
 0x491   : > { %v990_v5 = vperm.slane %v986_v4, %v3055_v30  ;;  %v972_v6 = vrot.slane %v971_v3, 4  ;;  %v996_v7 = vshrl.u32 %v971_v3, 16 }
 0x493   : > { %v995_v8 = vpack.i.b16 %v990_v5, %v971_v3  ;;  %v997_v9 = vshrl.u32 %v990_v5, 16  ;;  %v973_v10 = vsel %vm913_vm14, 0, %v972_v6  ;;  %v991_v11 = vrot.slane %v990_v5, 4 }
 0x494   : > { %v1002_v16 = vshrl.u32 %v973_v10, 16 }
 0x495   : > { %v1136_v12 = vsel %vm1131_vm15, %v995_v8, 0  ;;  %v998_v13 = vpack.i.b16 %v997_v9, %v996_v7  ;;  %v992_v14 = vsel %vm913_vm14, 0, %v991_v11 }
 0x496   : > { %1145 = vmatpush.bf16.xpose.msra.mxu1 %v1136_v12  ;;  %v1001_v15 = vpack.i.b16 %v992_v14, %v973_v10  ;;  %v1003_v17 = vshrl.u32 %v992_v14, 16 }
 0x497   : > { %v1155_v19 = vsel %vm1131_vm15, %v998_v13, 0 }
 0x498   : > { %1164 = vmatpush.bf16.xpose.msra.mxu2 %v1155_v19  ;;  %v1174_v20 = vsel %vm1131_vm15, %v1001_v15, 0  ;;  %v1004_v21 = vpack.i.b16 %v1003_v17, %v1002_v16 }
 0x499   : > { %1183 = vmatpush.bf16.xpose.msra.mxu3 %v1174_v20 }
 0x49a   : > { %v1193_v22 = vsel %vm1131_vm15, %v1004_v21, 0 }
 0x49b   : > { %1202 = vmatpush.bf16.xpose.msrb.mxu0 %v1193_v22 }
 0x49d   : > { %2221 = vmatmul.msk.bf16.vlgmr.msra.gmra.mxu1 %vm1131_vm15, %v1127_v23 }
 0x49f   : > { %2222 = vmatmul.msk.bf16.vlgmr.msra.gmra.mxu2 %vm1131_vm15, %v1128_v24 }
 0x4a0   : > { %2223 = vmatmul.msk.bf16.vlgmr.msra.gmra.mxu3 %vm1131_vm15, %v1129_v25 }
 0x4a2   : > { %2224 = vmatmul.msk.bf16.vlgmr.msrb.gmra.mxu0 %vm1131_vm15, %v1130_v26 }
 0x4b7   : > { %v1012_v34 = vpop.permute.xlu2 %1011 }
 0x4b8   : > { %v1023_v37 = vshrl.u32 %v1012_v34, 16 }
 0x4e7   : > { %v1008_v28 = vpop.permute.xlu0 %1007 }
 0x4e8   : > { %v1017_v29 = vshrl.u32 %v1008_v28, 16  ;;  %v1015_v32 = vpack.i.b16 %v1008_v28, %v1006_v27 }
 0x4ea   : > { %v1018_v33 = vpack.i.b16 %v1017_v29, %v1016_v31  ;;  %v1029_v35 = vperm.slane %v1015_v32, %v3051_v18 }
 0x4ec   : > { %v1055_v38 = vperm.slane %v1018_v33, %v3051_v18  ;;  %v1037_v41 = vrot.slane %v1029_v35, 4 }
 0x4ee   : > { %v1063_v44 = vrot.slane %v1055_v38, 4 }
 0x4ef   : > { %v1010_v36 = vpop.permute.xlu1 %1009 }
 0x4f0   : > { %v1021_v40 = vpack.i.b16 %v1012_v34, %v1010_v36  ;;  %v1022_v39 = vshrl.u32 %v1010_v36, 16 }
 0x4f2   : > { %v1024_v42 = vpack.i.b16 %v1023_v37, %v1022_v39  ;;  %v1034_v43 = vperm.slane %v1021_v40, %v3051_v18 }
 0x4f4   : > { %v1035_v45 = vrot.slane %v1034_v43, 4  ;;  %v1038_v46 = vsel %vm913_vm14, %v1034_v43, %v1037_v41  ;;  %v1060_v47 = vperm.slane %v1024_v42, %v3051_v18 }
 0x4f5   : > { %v1046_v48 = vperm.slane %v1038_v46, %v3055_v30 }
 0x4f6   : > { %v1036_v49 = vsel %vm913_vm14, %v1035_v45, %v1029_v35  ;;  %v1061_v50 = vrot.slane %v1060_v47, 4  ;;  %v1064_v51 = vsel %vm913_vm14, %v1060_v47, %v1063_v44 }
 0x4f7   : > { %v1042_v52 = vperm.slane %v1036_v49, %v3055_v30  ;;  %v1049_v53 = vrot.slane %v1046_v48, 4  ;;  %v1072_v54 = vperm.slane %v1064_v51, %v3055_v30 }
 0x4f8   : > { %v1062_v55 = vsel %vm913_vm14, %v1061_v50, %v1055_v38 }
 0x4f9   : > { %v1047_v56 = vrot.slane %v1042_v52, 4  ;;  %v1050_v57 = vsel %vm913_vm14, 0, %v1049_v53  ;;  %v1068_v58 = vperm.slane %v1062_v55, %v3055_v30  ;;  %v1075_v59 = vrot.slane %v1072_v54, 4 }
 0x4fa   : > { %v1082_v60 = vrot.slane %v1050_v57, 4  ;;  %v1077_v0 = vsel %vm913_vm14, %v1049_v53, %v1042_v52 }
 0x4fb   : > { %v1048_v61 = vsel %vm913_vm14, 0, %v1047_v56  ;;  %v1073_v62 = vrot.slane %v1068_v58, 4  ;;  %v1076_v63 = vsel %vm913_vm14, 0, %v1075_v59  ;;  %v1096_v5 = vsel %vm913_vm14, %v1075_v59, %v1068_v58 }
 0x4fc   : > { %v1083_v1 = vsel %vm913_vm14, %v1082_v60, %v1048_v61  ;;  %v1101_v2 = vrot.slane %v1076_v63, 4  ;;  %v1081_v7 = vperm.slane %v1077_v0, %v3051_v18  ;;  %v1100_v11 = vperm.slane %v1096_v5, %v3051_v18 }
 0x4fd   : > { %v1074_v3 = vsel %vm913_vm14, 0, %v1073_v62  ;;  %v1087_v4 = vperm.slane %v1083_v1, %v3051_v18 }
 0x4fe   : > { %v1102_v6 = vsel %vm913_vm14, %v1101_v2, %v1074_v3 }
 0x4ff   : > { %v1088_v8 = vrot.slane %v1087_v4, 4  ;;  %v1106_v9 = vperm.slane %v1102_v6, %v3051_v18 }
 0x501   : > { %v1089_v10 = vsel %vm913_vm14, %v1088_v8, %v1081_v7  ;;  %v1107_v12 = vrot.slane %v1106_v9, 4 }
 0x502   : > { %v1093_v13 = vperm.slane %v1089_v10, %v3055_v30 }
 0x503   : > { %v1108_v14 = vsel %vm913_vm14, %v1107_v12, %v1100_v11 }
 0x504   : > { %v1094_v15 = vrot.slane %v1093_v13, 4  ;;  %v1112_v16 = vperm.slane %v1108_v14, %v3055_v30  ;;  %v1118_v17 = vshrl.u32 %v1093_v13, 16 }
 0x506   : > { %v1095_v19 = vsel %vm913_vm14, 0, %v1094_v15  ;;  %v1113_v20 = vrot.slane %v1112_v16, 4  ;;  %v3122_v21 = vpack.i.b16 %v1112_v16, %v1093_v13  ;;  %v1119_v22 = vshrl.u32 %v1112_v16, 16 }
 0x507   : > { %v1124_v25 = vshrl.u32 %v1095_v19, 16 }
 0x508   : > { %v1114_v23 = vsel %vm913_vm14, 0, %v1113_v20  ;;  %v3125_v24 = vpack.i.b16 %v1119_v22, %v1118_v17 }
 0x509   : > { %v3127_v18 = vpack.i.b16 %v1114_v23, %v1095_v19  ;;  %v1125_v26 = vshrl.u32 %v1114_v23, 16 }
 0x50b   : > { %v3129_v27 = vpack.i.b16 %v1125_v26, %v1124_v25 }
 0x51a   : > { %v3131_v28 = vpop.f32.mrf.mxu1 }
 0x51f   : > { %v3133_v30 = vpop.f32.mrf.mxu0 }
 0x522   : > { %v3135_v29 = vpop.f32.mrf.mxu2  ;;  %v1149_v31 = vpop.f32.mrf.mxu1 }
 0x523   : > { %v3137_v32 = vpop.f32.mrf.mxu3 }
 0x527   : > { %v1206_v33 = vpop.f32.mrf.mxu0  ;;  %1211 = sbr.rel (%p2225_p9) target bundleno = 1721 (0x6b9), region = 100 }
 0x52a   : > { %v1168_v34 = vpop.f32.mrf.mxu2 }
 0x52b   : > { %v1187_v35 = vpop.f32.mrf.mxu3 }
 0x52c   : > { %v1212_v36 = vlaneseq  ;;  %v2751_v40 = vmov -1e+30   ;;  %v2752_v49 = vmov 0   ;;  %v1224_v50 = vld [vmem:[#allocation3 + $0x10] sm:$0xff]  ;;  %v1222_v51 = vld [vmem:[#allocation3] sm:$0xff]  ;;  %vm1310_vm1 = vcmask 7168  }
 0x52d   : > { %2465 = vset.pattern.permute.xlu0 %v2752_v49  ;;  %2464 = vset.pattern.permute.xlu2 %v2752_v49  ;;  %v1225_v59 = vld [vmem:[#allocation3 + $0x18] sm:$0xff]  ;;  %v1223_v60 = vld [vmem:[#allocation3 + $0x8] sm:$0xff]  ;;  %vm1350_vm2 = vcmask 1043456  }
 0x52e   : > { %v1213_v37 = vshrl.u32 %v1212_v36, 7  ;;  %v1215_v38 = vand.u32 127, %v1212_v36  ;;  %2466 = vset.pattern.permute.xlu1 %v2752_v49  ;;  %v1390_v10 = vsel %vm1350_vm2, %v3127_v18, 0  ;;  %v1409_v11 = vsel %vm1350_vm2, %v3129_v27, 0 }
 0x52f   : > { %1399 = vmatpush.bf16.msra.mxu2 %v1390_v10  ;;  %1418 = vmatpush.bf16.msra.mxu3 %v1409_v11  ;;  %v1352_v15 = vsel %vm1350_vm2, %v3122_v21, 0  ;;  %v1371_v19 = vsel %vm1350_vm2, %v3125_v24, 0  ;;  %v1315_v10 = vld [vmem:[#allocation5] sm:$0xff] }
 0x530   : > { %vm1216_vm0 = vcmp.ge.s32.totalorder %v1213_v37, %v1215_v38  ;;  %1361 = vmatpush.bf16.msra.mxu0 %v1352_v15  ;;  %1380 = vmatpush.bf16.msra.mxu1 %v1371_v19 }
 0x531   : > { %v1217_v39 = vsel %vm1216_vm0, 0.0, %v2751_v40 }
 0x532   : > { %v3142_v41 = vadd.f32 %v1217_v39, %v3137_v32  ;;  %v3145_v42 = vadd.f32 %v1217_v39, %v3131_v28  ;;  %v3152_v45 = vadd.f32 %v1217_v39, %v3133_v30  ;;  %v3155_v46 = vadd.f32 %v1217_v39, %v3135_v29 }
 0x534   : > { %v1232_v43 = vsel %vm1131_vm15, %v3142_v41, -inf  ;;  %v1226_v44 = vsel %vm1131_vm15, %v3145_v42, -inf  ;;  %v1235_v47 = vsel %vm1131_vm15, %v3152_v45, -inf  ;;  %v1229_v48 = vsel %vm1131_vm15, %v3155_v46, -inf }
 0x535   : > { %1233 = vmax.xlane.f32.xlu0 %v1232_v43  ;;  %1227 = vmax.xlane.f32.xlu1 %v1226_v44 }
 0x53d   : > { %1236 = vmax.xlane.f32.xlu0 %v1235_v47  ;;  %1230 = vmax.xlane.f32.xlu1 %v1229_v48 }
 0x5a8   : > { %v1234_v52 = vpop.xlane.xlu0 %1233  ;;  %v1228_v53 = vpop.xlane.xlu1 %1227 }
 0x5a9   : > { %v1240_v54 = vmax.f32 %v1224_v50, %v1234_v52  ;;  %v1238_v55 = vmax.f32 %v1222_v51, %v1228_v53 }
 0x5ab   : > { %v1244_v56 = vsub.f32 %v1224_v50, %v1240_v54  ;;  %1434 = vst.msk [vmem:[#allocation3 + $0x10] sm:$0xff] %vm1310_vm1, %v1240_v54  ;;  %1266 = vperm.xlu2 %2464, %v1240_v54   ;;  %1256 = vperm.xlu0 %2465, %v1238_v55   ;;  %v1242_v57 = vsub.f32 %v1222_v51, %v1238_v55  ;;  %v1289_v54 = vld [vmem:[#allocation4 + $0x18] sm:$0xff] }
 0x5ac   : > { %1432 = vst.msk [vmem:[#allocation3] sm:$0xff] %vm1310_vm1, %v1238_v55 }
 0x5ad   : > { %v1250_v58 = vmul.f32 1.442695, %v1244_v56  ;;  %v1246_v61 = vmul.f32 1.442695, %v1242_v57 }
 0x5af   : > { %2467 = vpow2.f32 %v1250_v58  ;;  %v1317_v58 = vld [vmem:[#allocation5 + $0x10] sm:$0xff] }
 0x5b0   : > { %v1237_v62 = vpop.xlane.xlu0 %1236  ;;  %v1231_v63 = vpop.xlane.xlu1 %1230  ;;  %2469 = vpow2.f32 %v1246_v61 }
 0x5b1   : > { %v1241_v0 = vmax.f32 %v1225_v59, %v1237_v62  ;;  %v1239_v1 = vmax.f32 %v1223_v60, %v1231_v63  ;;  %v1286_v62 = vld [vmem:[#allocation4] sm:$0xff]  ;;  %v1318_v63 = vld [vmem:[#allocation5 + $0x18] sm:$0xff] }
 0x5b3   : > { %1435 = vst.msk [vmem:[#allocation3 + $0x18] sm:$0xff] %vm1310_vm1, %v1241_v0  ;;  %1271 = vperm.xlu2 %2464, %v1241_v0   ;;  %1261 = vperm.xlu1 %2466, %v1239_v1   ;;  %v1243_v2 = vsub.f32 %v1223_v60, %v1239_v1  ;;  %v1245_v6 = vsub.f32 %v1225_v59, %v1241_v0 }
 0x5b4   : > { %1433 = vst.msk [vmem:[#allocation3 + $0x8] sm:$0xff] %vm1310_vm1, %v1239_v1 }
 0x5b5   : > { %v2468_v3 = vpop.eup %2467  ;;  %v1248_v4 = vmul.f32 1.442695, %v1243_v2  ;;  %v1252_v7 = vmul.f32 1.442695, %v1245_v6 }
 0x5b6   : > { %1331 = vperm.xlu0 %2465, %v2468_v3   ;;  %v3165_v5 = vpop.eup %2469 }
 0x5b7   : > { %2471 = vpow2.f32 %v1248_v4  ;;  %v1290_v0 = vmul.f32 %v3165_v5, %v1286_v62 }
 0x5b8   : > { %2473 = vpow2.f32 %v1252_v7 }
 0x5bb   : > { %1321 = vperm.xlu1 %2466, %v3165_v5  }
 0x5bd   : > { %v3168_v8 = vpop.eup %2471 }
 0x5be   : > { %v2474_v9 = vpop.eup %2473 }
 0x5bf   : > { %v1293_v55 = vmul.f32 %v2474_v9, %v1289_v54 }
 0x5c3   : > { %1326 = vperm.xlu1 %2466, %v3168_v8  }
 0x5cb   : > { %1336 = vperm.xlu1 %2466, %v2474_v9   ;;  %v1287_v9 = vld [vmem:[#allocation4 + $0x8] sm:$0xff] }
 0x5cc   : > { %v1291_v11 = vmul.f32 %v3168_v8, %v1287_v9 }
 0x605   : > { %v1267_v12 = vpop.permute.xlu2 %1266 }
 0x606   : > { %v1276_v13 = vsub.f32 %v3142_v41, %v1267_v12 }
 0x608   : > { %v1282_v14 = vmul.f32 1.442695, %v1276_v13 }
 0x60a   : > { %2475 = vpow2.f32 %v1282_v14 }
 0x60d   : > { %v1272_v16 = vpop.permute.xlu2 %1271 }
 0x60e   : > { %v1277_v17 = vsub.f32 %v3152_v45, %v1272_v16 }
 0x610   : > { %v2476_v20 = vpop.eup %2475  ;;  %v1284_v22 = vmul.f32 1.442695, %v1277_v17  ;;  %v1316_v17 = vld [vmem:[#allocation5 + $0x8] sm:$0xff] }
 0x611   : > { %v1300_v23 = vsel %vm1131_vm15, %v2476_v20, 0.0  ;;  %v1345_v25 = vpack.c.bf16 %v2476_v20, %v2476_v20 }
 0x612   : > { %2477 = vpow2.f32 %v1284_v22  ;;  %1301 = vadd.xlane.f32.xlu0 %v1300_v23 }
 0x613   : > { %2228 = vmatmul.msk.bf16.vlgmr.msra.gmra.mxu2 %vm1131_vm15, %v1345_v25 }
 0x618   : > { %v2478_v26 = vpop.eup %2477 }
 0x619   : > { %v1303_v31 = vsel %vm1131_vm15, %v2478_v26, 0.0  ;;  %v1346_v33 = vpack.c.bf16 %v2478_v26, %v2478_v26 }
 0x61a   : > { %1304 = vadd.xlane.f32.xlu1 %v1303_v31 }
 0x61b   : > { %2229 = vmatmul.msk.bf16.vlgmr.msra.gmra.mxu3 %vm1131_vm15, %v1346_v33 }
 0x61d   : > { %v1257_v34 = vpop.permute.xlu0 %1256 }
 0x61e   : > { %v1274_v35 = vsub.f32 %v3145_v42, %v1257_v34 }
 0x620   : > { %v1278_v36 = vmul.f32 1.442695, %v1274_v35 }
 0x622   : > { %2479 = vpow2.f32 %v1278_v36 }
 0x625   : > { %v1262_v37 = vpop.permute.xlu1 %1261 }
 0x626   : > { %v1275_v38 = vsub.f32 %v3155_v46, %v1262_v37  ;;  %v1288_v46 = vld [vmem:[#allocation4 + $0x10] sm:$0xff] }
 0x627   : > { %v1292_v50 = vmul.f32 %v2468_v3, %v1288_v46 }
 0x628   : > { %v2480_v40 = vpop.eup %2479  ;;  %v1280_v39 = vmul.f32 1.442695, %v1275_v38  ;;  %v1332_v49 = vpop.permute.xlu0 %1331 }
 0x629   : > { %v1294_v41 = vsel %vm1131_vm15, %v2480_v40, 0.0  ;;  %v1343_v43 = vpack.c.bf16 %v2480_v40, %v2480_v40  ;;  %v1341_v59 = vmul.f32 %v1332_v49, %v1317_v58 }
 0x62a   : > { %2481 = vpow2.f32 %v1280_v39  ;;  %1295 = vadd.xlane.f32.xlu2 %v1294_v41 }
 0x62b   : > { %2226 = vmatmul.msk.bf16.vlgmr.msra.gmra.mxu0 %vm1131_vm15, %v1343_v43 }
 0x62d   : > { %v1322_v42 = vpop.permute.xlu1 %1321 }
 0x62e   : > { %v1339_v15 = vmul.f32 %v1322_v42, %v1315_v10 }
 0x630   : > { %v2482_v44 = vpop.eup %2481 }
 0x631   : > { %v1297_v45 = vsel %vm1131_vm15, %v2482_v44, 0.0  ;;  %v1344_v47 = vpack.c.bf16 %v2482_v44, %v2482_v44 }
 0x632   : > { %1298 = vadd.xlane.f32.xlu2 %v1297_v45 }
 0x633   : > { %2227 = vmatmul.msk.bf16.vlgmr.msra.gmra.mxu1 %vm1131_vm15, %v1344_v47 }
 0x635   : > { %v1327_v48 = vpop.permute.xlu1 %1326 }
 0x636   : > { %v1340_v19 = vmul.f32 %v1327_v48, %v1316_v17 }
 0x63d   : > { %v1337_v51 = vpop.permute.xlu1 %1336 }
 0x63e   : > { %v1342_v1 = vmul.f32 %v1337_v51, %v1318_v63 }
 0x685   : > { %v1302_v52 = vpop.xlane.xlu0 %1301 }
 0x686   : > { %v1308_v53 = vadd.f32 %v1302_v52, %v1292_v50 }
 0x688   : > { %1313 = vst.msk [vmem:[#allocation4 + $0x10] sm:$0xff] %vm1310_vm1, %v1308_v53 }
 0x68d   : > { %v1305_v56 = vpop.xlane.xlu1 %1304 }
 0x68e   : > { %v1309_v57 = vadd.f32 %v1305_v56, %v1293_v55 }
 0x690   : > { %1314 = vst.msk [vmem:[#allocation4 + $0x18] sm:$0xff] %vm1310_vm1, %v1309_v57 }
 0x696   : > { %v1401_v60 = vpop.f32.mrf.mxu2 }
 0x697   : > { %v1426_v61 = vadd.f32 %v1401_v60, %v1341_v59 }
 0x699   : > { %1430 = vst.msk [vmem:[#allocation5 + $0x10] sm:$0xff] %vm1131_vm15, %v1426_v61 }
 0x69d   : > { %v1296_v2 = vpop.xlane.xlu2 %1295 }
 0x69e   : > { %v1306_v3 = vadd.f32 %v1296_v2, %v1290_v0  ;;  %v1420_v4 = vpop.f32.mrf.mxu3  ;;  %v1403_v6 = vpop.f32.mrf.mxu2 }
 0x69f   : > { %v1427_v7 = vadd.f32 %v1420_v4, %v1342_v1 }
 0x6a0   : > { %1311 = vst.msk [vmem:[#allocation4] sm:$0xff] %vm1310_vm1, %v1306_v3 }
 0x6a1   : > { %1431 = vst.msk [vmem:[#allocation5 + $0x18] sm:$0xff] %vm1131_vm15, %v1427_v7 }
 0x6a5   : > { %v1299_v12 = vpop.xlane.xlu2 %1298 }
 0x6a6   : > { %v1307_v13 = vadd.f32 %v1299_v12, %v1291_v11  ;;  %v1422_v14 = vpop.f32.mrf.mxu3 }
 0x6a8   : > { %1312 = vst.msk [vmem:[#allocation4 + $0x8] sm:$0xff] %vm1310_vm1, %v1307_v13  ;;  %v1363_v5 = vpop.f32.mrf.mxu0 }
 0x6a9   : > { %v1424_v16 = vadd.f32 %v1363_v5, %v1339_v15 }
 0x6ab   : > { %1428 = vst.msk [vmem:[#allocation5] sm:$0xff] %vm1131_vm15, %v1424_v16 }
 0x6b0   : > { %v1365_v20 = vpop.f32.mrf.mxu0  ;;  %v1382_v22 = vpop.f32.mrf.mxu1 }
 0x6b1   : > { %v1425_v23 = vadd.f32 %v1382_v22, %v1340_v19 }
 0x6b3   : > { %1429 = vst.msk [vmem:[#allocation5 + $0x8] sm:$0xff] %vm1131_vm15, %v1425_v23 }
 0x6b8   : > { %v1384_v25 = vpop.f32.mrf.mxu1 }
 0x6b9 PF: > { %p2230_p10 = scmp.ge.s32.totalorder %s2705_s16, %s2709_s17 }
 0x6bb   : > { %1439 = sbr.rel (%p2230_p10) target bundleno = 2117 (0x845), region = 104 }
 0x6c0   : > { %v1450_v8 = vsel %vm1131_vm15, %v3137_v32, -inf  ;;  %v1444_v26 = vsel %vm1131_vm15, %v3131_v28, -inf  ;;  %v1453_v31 = vsel %vm1131_vm15, %v3133_v30, -inf  ;;  %v1447_v33 = vsel %vm1131_vm15, %v3135_v29, -inf  ;;  %v1442_v35 = vld [vmem:[#allocation3 + $0x10] sm:$0xff]  ;;  %v1440_v36 = vld [vmem:[#allocation3] sm:$0xff] }
 0x6c1   : > { %1451 = vmax.xlane.f32.xlu0 %v1450_v8  ;;  %1445 = vmax.xlane.f32.xlu1 %v1444_v26  ;;  %v2753_v34 = vmov 0   ;;  %vm1528_vm3 = vcmask 7168   ;;  %v1443_v45 = vld [vmem:[#allocation3 + $0x18] sm:$0xff]  ;;  %v1441_v47 = vld [vmem:[#allocation3 + $0x8] sm:$0xff]  ;;  %vm1568_vm4 = vcmask 1043456  }
 0x6c2   : > { %2484 = vset.pattern.permute.xlu0 %v2753_v34  ;;  %2483 = vset.pattern.permute.xlu2 %v2753_v34  ;;  %v1608_v59 = vsel %vm1568_vm4, %v3127_v18, 0  ;;  %v1627_v60 = vsel %vm1568_vm4, %v3129_v27, 0  ;;  %v1570_v0 = vsel %vm1568_vm4, %v3122_v21, 0  ;;  %v1589_v3 = vsel %vm1568_vm4, %v3125_v24, 0  ;;  %v1507_v26 = vld [vmem:[#allocation4 + $0x18] sm:$0xff] }
 0x6c3   : > { %2485 = vset.pattern.permute.xlu1 %v2753_v34  ;;  %1617 = vmatpush.bf16.msra.mxu2 %v1608_v59 }
 0x6c4   : > { %1636 = vmatpush.bf16.msra.mxu3 %v1627_v60  ;;  %1579 = vmatpush.bf16.msra.mxu0 %v1570_v0 }
 0x6c5   : > { %1598 = vmatpush.bf16.msra.mxu1 %v1589_v3 }
 0x6c9   : > { %1454 = vmax.xlane.f32.xlu0 %v1453_v31  ;;  %1448 = vmax.xlane.f32.xlu1 %v1447_v33 }
 0x734   : > { %v1452_v37 = vpop.xlane.xlu0 %1451  ;;  %v1446_v38 = vpop.xlane.xlu1 %1445 }
 0x735   : > { %v1458_v40 = vmax.f32 %v1442_v35, %v1452_v37  ;;  %v1456_v39 = vmax.f32 %v1440_v36, %v1446_v38 }
 0x737   : > { %v1462_v41 = vsub.f32 %v1442_v35, %v1458_v40  ;;  %1652 = vst.msk [vmem:[#allocation3 + $0x10] sm:$0xff] %vm1528_vm3, %v1458_v40  ;;  %1484 = vperm.xlu2 %2483, %v1458_v40   ;;  %1474 = vperm.xlu0 %2484, %v1456_v39   ;;  %v1460_v43 = vsub.f32 %v1440_v36, %v1456_v39  ;;  %v1535_v35 = vld [vmem:[#allocation5 + $0x10] sm:$0xff]  ;;  %v1504_v40 = vld [vmem:[#allocation4] sm:$0xff] }
 0x738   : > { %1650 = vst.msk [vmem:[#allocation3] sm:$0xff] %vm1528_vm3, %v1456_v39  ;;  %v1536_v39 = vld [vmem:[#allocation5 + $0x18] sm:$0xff] }
 0x739   : > { %v1468_v44 = vmul.f32 1.442695, %v1462_v41  ;;  %v1464_v42 = vmul.f32 1.442695, %v1460_v43 }
 0x73b   : > { %2486 = vpow2.f32 %v1468_v44 }
 0x73c   : > { %v1455_v48 = vpop.xlane.xlu0 %1454  ;;  %v1449_v49 = vpop.xlane.xlu1 %1448  ;;  %2488 = vpow2.f32 %v1464_v42 }
 0x73d   : > { %v1459_v46 = vmax.f32 %v1443_v45, %v1455_v48  ;;  %v1457_v50 = vmax.f32 %v1441_v47, %v1449_v49  ;;  %v1505_v49 = vld [vmem:[#allocation4 + $0x8] sm:$0xff] }
 0x73f   : > { %1653 = vst.msk [vmem:[#allocation3 + $0x18] sm:$0xff] %vm1528_vm3, %v1459_v46  ;;  %1489 = vperm.xlu2 %2483, %v1459_v46   ;;  %1479 = vperm.xlu1 %2485, %v1457_v50   ;;  %v1461_v51 = vsub.f32 %v1441_v47, %v1457_v50  ;;  %v1463_v55 = vsub.f32 %v1443_v45, %v1459_v46  ;;  %v1533_v46 = vld [vmem:[#allocation5] sm:$0xff] }
 0x740   : > { %1651 = vst.msk [vmem:[#allocation3 + $0x8] sm:$0xff] %vm1528_vm3, %v1457_v50 }
 0x741   : > { %v2487_v52 = vpop.eup %2486  ;;  %v1466_v53 = vmul.f32 1.442695, %v1461_v51  ;;  %v1470_v56 = vmul.f32 1.442695, %v1463_v55 }
 0x742   : > { %1549 = vperm.xlu0 %2484, %v2487_v52   ;;  %v3211_v54 = vpop.eup %2488 }
 0x743   : > { %2490 = vpow2.f32 %v1466_v53  ;;  %v1508_v41 = vmul.f32 %v3211_v54, %v1504_v40 }
 0x744   : > { %2492 = vpow2.f32 %v1470_v56 }
 0x747   : > { %1539 = vperm.xlu1 %2485, %v3211_v54  }
 0x749   : > { %v3214_v57 = vpop.eup %2490 }
 0x74a   : > { %v2493_v58 = vpop.eup %2492  ;;  %v1509_v50 = vmul.f32 %v3214_v57, %v1505_v49 }
 0x74b   : > { %v1511_v31 = vmul.f32 %v2493_v58, %v1507_v26 }
 0x74f   : > { %1544 = vperm.xlu1 %2485, %v3214_v57  }
 0x757   : > { %1554 = vperm.xlu1 %2485, %v2493_v58   ;;  %v1534_v58 = vld [vmem:[#allocation5 + $0x8] sm:$0xff] }
 0x791   : > { %v1485_v61 = vpop.permute.xlu2 %1484 }
 0x792   : > { %v1494_v62 = vsub.f32 %v3137_v32, %v1485_v61 }
 0x794   : > { %v1500_v63 = vmul.f32 1.442695, %v1494_v62 }
 0x796   : > { %2494 = vpow2.f32 %v1500_v63 }
 0x799   : > { %v1490_v1 = vpop.permute.xlu2 %1489 }
 0x79a   : > { %v1495_v2 = vsub.f32 %v3133_v30, %v1490_v1 }
 0x79c   : > { %v2495_v4 = vpop.eup %2494  ;;  %v1502_v18 = vmul.f32 1.442695, %v1495_v2 }
 0x79d   : > { %v1518_v6 = vsel %vm1131_vm15, %v2495_v4, 0.0  ;;  %v1563_v27 = vpack.c.bf16 %v2495_v4, %v2495_v4 }
 0x79e   : > { %2496 = vpow2.f32 %v1502_v18  ;;  %1519 = vadd.xlane.f32.xlu0 %v1518_v6 }
 0x79f   : > { %2233 = vmatmul.msk.bf16.vlgmr.msra.gmra.mxu2 %vm1131_vm15, %v1563_v27 }
 0x7a4   : > { %v2497_v32 = vpop.eup %2496 }
 0x7a5   : > { %v1521_v21 = vsel %vm1131_vm15, %v2497_v32, 0.0  ;;  %v1564_v7 = vpack.c.bf16 %v2497_v32, %v2497_v32 }
 0x7a6   : > { %1522 = vadd.xlane.f32.xlu1 %v1521_v21 }
 0x7a7   : > { %2234 = vmatmul.msk.bf16.vlgmr.msra.gmra.mxu3 %vm1131_vm15, %v1564_v7 }
 0x7a9   : > { %v1475_v30 = vpop.permute.xlu0 %1474 }
 0x7aa   : > { %v1492_v24 = vsub.f32 %v3131_v28, %v1475_v30 }
 0x7ac   : > { %v1496_v9 = vmul.f32 1.442695, %v1492_v24 }
 0x7ae   : > { %2498 = vpow2.f32 %v1496_v9 }
 0x7b1   : > { %v1480_v10 = vpop.permute.xlu1 %1479 }
 0x7b2   : > { %v1493_v11 = vsub.f32 %v3135_v29, %v1480_v10  ;;  %v1506_v29 = vld [vmem:[#allocation4 + $0x10] sm:$0xff] }
 0x7b3   : > { %v1510_v22 = vmul.f32 %v2487_v52, %v1506_v29 }
 0x7b4   : > { %v2499_v12 = vpop.eup %2498  ;;  %v1498_v13 = vmul.f32 1.442695, %v1493_v11  ;;  %v1550_v20 = vpop.permute.xlu0 %1549 }
 0x7b5   : > { %v1512_v14 = vsel %vm1131_vm15, %v2499_v12, 0.0  ;;  %v1561_v15 = vpack.c.bf16 %v2499_v12, %v2499_v12  ;;  %v1559_v36 = vmul.f32 %v1550_v20, %v1535_v35 }
 0x7b6   : > { %2500 = vpow2.f32 %v1498_v13  ;;  %1513 = vadd.xlane.f32.xlu2 %v1512_v14 }
 0x7b7   : > { %2231 = vmatmul.msk.bf16.vlgmr.msra.gmra.mxu0 %vm1131_vm15, %v1561_v15 }
 0x7b9   : > { %v1540_v28 = vpop.permute.xlu1 %1539 }
 0x7ba   : > { %v1557_v55 = vmul.f32 %v1540_v28, %v1533_v46 }
 0x7bc   : > { %v2501_v5 = vpop.eup %2500 }
 0x7bd   : > { %v1515_v16 = vsel %vm1131_vm15, %v2501_v5, 0.0  ;;  %v1562_v17 = vpack.c.bf16 %v2501_v5, %v2501_v5 }
 0x7be   : > { %1516 = vadd.xlane.f32.xlu2 %v1515_v16 }
 0x7bf   : > { %2232 = vmatmul.msk.bf16.vlgmr.msra.gmra.mxu1 %vm1131_vm15, %v1562_v17 }
 0x7c1   : > { %v1545_v19 = vpop.permute.xlu1 %1544 }
 0x7c2   : > { %v1558_v59 = vmul.f32 %v1545_v19, %v1534_v58 }
 0x7c9   : > { %v1555_v23 = vpop.permute.xlu1 %1554 }
 0x7ca   : > { %v1560_v43 = vmul.f32 %v1555_v23, %v1536_v39 }
 0x811   : > { %v1520_v25 = vpop.xlane.xlu0 %1519 }
 0x812   : > { %v1526_v8 = vadd.f32 %v1520_v25, %v1510_v22 }
 0x814   : > { %1531 = vst.msk [vmem:[#allocation4 + $0x10] sm:$0xff] %vm1528_vm3, %v1526_v8 }
 0x819   : > { %v1523_v33 = vpop.xlane.xlu1 %1522 }
 0x81a   : > { %v1527_v34 = vadd.f32 %v1523_v33, %v1511_v31 }
 0x81c   : > { %1532 = vst.msk [vmem:[#allocation4 + $0x18] sm:$0xff] %vm1528_vm3, %v1527_v34 }
 0x822   : > { %v1619_v37 = vpop.f32.mrf.mxu2 }
 0x823   : > { %v1644_v38 = vadd.f32 %v1619_v37, %v1559_v36 }
 0x825   : > { %1648 = vst.msk [vmem:[#allocation5 + $0x10] sm:$0xff] %vm1131_vm15, %v1644_v38 }
 0x829   : > { %v1514_v44 = vpop.xlane.xlu2 %1513 }
 0x82a   : > { %v1524_v45 = vadd.f32 %v1514_v44, %v1508_v41  ;;  %v1638_v47 = vpop.f32.mrf.mxu3  ;;  %v1621_v42 = vpop.f32.mrf.mxu2 }
 0x82b   : > { %v1645_v48 = vadd.f32 %v1638_v47, %v1560_v43 }
 0x82c   : > { %1529 = vst.msk [vmem:[#allocation4] sm:$0xff] %vm1528_vm3, %v1524_v45 }
 0x82d   : > { %1649 = vst.msk [vmem:[#allocation5 + $0x18] sm:$0xff] %vm1131_vm15, %v1645_v48 }
 0x831   : > { %v1517_v51 = vpop.xlane.xlu2 %1516 }
 0x832   : > { %v1525_v52 = vadd.f32 %v1517_v51, %v1509_v50  ;;  %v1640_v53 = vpop.f32.mrf.mxu3 }
 0x834   : > { %1530 = vst.msk [vmem:[#allocation4 + $0x8] sm:$0xff] %vm1528_vm3, %v1525_v52  ;;  %v1581_v54 = vpop.f32.mrf.mxu0 }
 0x835   : > { %v1642_v56 = vadd.f32 %v1581_v54, %v1557_v55 }
 0x837   : > { %1646 = vst.msk [vmem:[#allocation5] sm:$0xff] %vm1131_vm15, %v1642_v56 }
 0x83c   : > { %v1583_v60 = vpop.f32.mrf.mxu0  ;;  %v1600_v61 = vpop.f32.mrf.mxu1 }
 0x83d   : > { %v1643_v62 = vadd.f32 %v1600_v61, %v1558_v59 }
 0x83f   : > { %1647 = vst.msk [vmem:[#allocation5 + $0x8] sm:$0xff] %vm1131_vm15, %v1643_v62 }
 0x844   : > { %v1602_v63 = vpop.f32.mrf.mxu1 }
 0x845 PF: > { %p2235_p11 = scmp.ne.s32.totalorder %s2705_s16, %s2709_s17 }
 0x846   : > { %s2757_s16 = smov (!%p2235_p11), 8   ;;  %s2758_s24 = smov (!%p2235_p11), 24  }
 0x847   : > { %1657 = sbr.rel (%p2235_p11) target bundleno = 3083 (0xc0b), region = 108  ;;  %s2759_s19 = smov (!%p2235_p11), 16  }
 0x848   : > { %s3416_s13 = sld [smem:[#allocation28_spill]] (!%p2235_p11) }
 0x849   : > { %s3417_s26 = sld [smem:[#allocation29_spill]] (!%p2235_p11) }
 0x84a   : > { %s3418_s27 = sld [smem:[#allocation30_spill]] (!%p2235_p11) }
 0x84c   : > { %v1660_v57 = vld [vmem:[#allocation4 + $0x10] sm:$0xff]  ;;  %v1658_v0 = vld [vmem:[#allocation4] sm:$0xff]  ;;  %v2754_v1 = vmov 0   ;;  %v1661_v2 = vld [vmem:[#allocation4 + $0x18] sm:$0xff]  ;;  %v2755_v11 = vmov 1983009808  }
 0x84d   : > { %2503 = vset.pattern.permute.xlu1 %v2754_v1  ;;  %2502 = vset.pattern.permute.xlu0 %v2754_v1  ;;  %2509 = vrcp.f32 %v1660_v57  ;;  %v1659_v3 = vld [vmem:[#allocation4 + $0x8] sm:$0xff]  ;;  %v1668_v7 = vld [vmem:[#allocation5 + $0x10] sm:$0xff]  ;;  %v1666_v30 = vld [vmem:[#allocation5] sm:$0xff]  ;;  %v1712_v12 = vunpack.c.l.s4 %v2755_v11  ;;  %v2756_v29 = vmov 1934713408   ;;  %vm1721_vm5 = vcmask 1047556  }
 0x84e   : > { %2511 = vrcp.f32 %v1658_v0  ;;  %v1669_v10 = vld [vmem:[#allocation5 + $0x18] sm:$0xff]  ;;  %v1667_v13 = vld [vmem:[#allocation5 + $0x8] sm:$0xff]  ;;  %v1726_v22 = vunpack.c.l.s4 %v2756_v29  ;;  %vm1825_vm6 = vcmask 64512   ;;  %vm1829_vm7 = vcmask 130048  }
 0x84f   : > { %2513 = vrcp.f32 %v1661_v2  ;;  %v1713_v19 = vunpack.c.0.s8 %v1712_v12  ;;  %vm1832_vm8 = vcmask 195584   ;;  %vm1855_vm9 = vcmask 261120  }
 0x850   : > { %2515 = vrcp.f32 %v1659_v3  ;;  %v1727_v37 = vunpack.c.0.s8 %v1726_v22 }
 0x853   : > { %v2510_v4 = vpop.eup %2509 }
 0x854   : > { %v2512_v18 = vpop.eup %2511  ;;  %1682 = vperm.xlu1 %2503, %v2510_v4  }
 0x855   : > { %1672 = vperm.xlu0 %2502, %v2512_v18   ;;  %v2514_v6 = vpop.eup %2513 }
 0x856   : > { %v2516_v27 = vpop.eup %2515 }
 0x85c   : > { %1687 = vperm.xlu1 %2503, %v2514_v6  }
 0x85d   : > { %1677 = vperm.xlu0 %2502, %v2516_v27  }
 0x8c6   : > { %v1683_v32 = vpop.permute.xlu1 %1682 }
 0x8c7   : > { %v1673_v21 = vpop.permute.xlu0 %1672  ;;  %v1692_v24 = vmul.f32 %v1683_v32, %v1668_v7 }
 0x8c8   : > { %v1690_v9 = vmul.f32 %v1673_v21, %v1666_v30 }
 0x8c9   : > { %v1696_v15 = vpack.c.bf16 %v1692_v24, %v1692_v24 }
 0x8ca   : > { %v1694_v17 = vpack.c.bf16 %v1690_v9, %v1690_v9 }
 0x8cb   : > { %v1707_v25 = vshrl.u32 %v1696_v15, 16 }
 0x8cc   : > { %v1701_v31 = vshrl.u32 %v1694_v17, 16 }
 0x8ce   : > { %v1688_v14 = vpop.permute.xlu1 %1687 }
 0x8cf   : > { %v1693_v5 = vmul.f32 %v1688_v14, %v1669_v10  ;;  %v1678_v16 = vpop.permute.xlu0 %1677 }
 0x8d0   : > { %v1691_v28 = vmul.f32 %v1678_v16, %v1667_v13 }
 0x8d1   : > { %v1697_v20 = vpack.c.bf16 %v1693_v5, %v1693_v5 }
 0x8d2   : > { %v1695_v23 = vpack.c.bf16 %v1691_v28, %v1691_v28 }
 0x8d3   : > { %v1706_v8 = vpack.i.b16 %v1697_v20, %v1696_v15  ;;  %v1708_v26 = vshrl.u32 %v1697_v20, 16 }
 0x8d4   : > { %v1700_v33 = vpack.i.b16 %v1695_v23, %v1694_v17  ;;  %v1702_v34 = vshrl.u32 %v1695_v23, 16 }
 0x8d5   : > { %v1709_v35 = vpack.i.b16 %v1708_v26, %v1707_v25  ;;  %v1719_v36 = vperm.slane %v1706_v8, %v1713_v19 }
 0x8d6   : > { %v1703_v38 = vpack.i.b16 %v1702_v34, %v1701_v31  ;;  %v1714_v40 = vperm.slane %v1700_v33, %v1713_v19  ;;  %v2296_v31 = vld [vmem:[#allocation9 + $0x8] sm:$0xff]  ;;  %v2295_v33 = vld [vmem:[#allocation9] sm:$0xff] }
 0x8d7   : > { %v1720_v39 = vrot.slane %v1719_v36, 4  ;;  %v1746_v41 = vperm.slane %v1709_v35, %v1713_v19  ;;  %1864 = vmatpush.bf16.msra.mxu0 %v2296_v31 }
 0x8d8   : > { %v1723_v43 = vrot.slane %v1714_v40, 4  ;;  %v1741_v44 = vperm.slane %v1703_v38, %v1713_v19 }
 0x8d9   : > { %v1747_v45 = vrot.slane %v1746_v41, 4  ;;  %v1722_v47 = vsel %vm1721_vm5, %v1720_v39, %v1714_v40  ;;  %v2504_v39 = vld [vmem:[%s3373_s7] ss:$0 sm:$0xff] }
 0x8da   : > { %v1724_v42 = vsel %vm1721_vm5, %v1719_v36, %v1723_v43  ;;  %v1728_v48 = vperm.slane %v1722_v47, %v1727_v37  ;;  %v1749_v49 = vrot.slane %v1741_v44, 4  ;;  %v1871_v43 = vld [vmem:[%s2975_s23] sm:$0xff] }
 0x8db   : > { %v1732_v46 = vperm.slane %v1724_v42, %v1727_v37  ;;  %v1748_v50 = vsel %vm1721_vm5, %v1747_v45, %v1741_v44  ;;  %1865 = vmatpush.bf16.msra.mxu0 %v2295_v33 }
 0x8dc   : > { %v1750_v51 = vsel %vm1721_vm5, %v1746_v41, %v1749_v49  ;;  %v1754_v52 = vperm.slane %v1748_v50, %v1727_v37  ;;  %v1733_v53 = vrot.slane %v1728_v48, 4 }
 0x8dd   : > { %v1735_v55 = vrot.slane %v1732_v46, 4  ;;  %v1758_v54 = vperm.slane %v1750_v51, %v1727_v37 }
 0x8de   : > { %v1759_v58 = vrot.slane %v1754_v52, 4  ;;  %v1734_v61 = vsel %vm1721_vm5, 0, %v1733_v53 }
 0x8df   : > { %v1736_v56 = vsel %vm1721_vm5, 0, %v1735_v55  ;;  %v1761_v59 = vrot.slane %v1758_v54, 4  ;;  %v1763_v63 = vsel %vm1721_vm5, %v1735_v55, %v1728_v48  ;;  %v2760_v48 = vmov 32.0  }
 0x8e0   : > { %v1768_v60 = vrot.slane %v1736_v56, 4  ;;  %v1760_v1 = vsel %vm1721_vm5, 0, %v1759_v58  ;;  %v1767_v18 = vperm.slane %v1763_v63, %v1713_v19  ;;  %2517 = vrcp.f32 %v2760_v48 }
 0x8e1   : > { %v1762_v62 = vsel %vm1721_vm5, 0, %v1761_v59  ;;  %v1782_v3 = vsel %vm1721_vm5, %v1761_v59, %v1754_v52 }
 0x8e2   : > { %v1787_v57 = vrot.slane %v1762_v62, 4  ;;  %v1769_v0 = vsel %vm1721_vm5, %v1768_v60, %v1734_v61  ;;  %v1786_v21 = vperm.slane %v1782_v3, %v1713_v19  ;;  %v2298_v60 = vld [vmem:[#allocation11 + $0x8] sm:$0xff]  ;;  %v2297_v61 = vld [vmem:[#allocation11] sm:$0xff]  ;;  %v2303_v3 = vld [vmem:[%s3378_s12 + $0x20] sm:$0xff] }
 0x8e3   : > { %v1773_v2 = vperm.slane %v1769_v0, %v1713_v19  ;;  %1942 = vmatpush.bf16.msra.mxu1 %v2298_v60  ;;  %v2306_v62 = vld [vmem:[%s3378_s12 + $0x38] sm:$0xff]  ;;  %v2305_v0 = vld [vmem:[%s3378_s12 + $0x30] sm:$0xff] }
 0x8e4   : > { %v1788_v4 = vsel %vm1721_vm5, %v1787_v57, %v1760_v1  ;;  %2019 = vmatpush.bf16.msra.mxu2 %v2306_v62 }
 0x8e5   : > { %v1774_v6 = vrot.slane %v1773_v2, 4  ;;  %v1792_v27 = vperm.slane %v1788_v4, %v1713_v19  ;;  %v2304_v2 = vld [vmem:[%s3378_s12 + $0x28] sm:$0xff] }
 0x8e6   : > { %v2518_v49 = vpop.eup %2517 }
 0x8e7   : > { %v1775_v32 = vsel %vm1721_vm5, %v1774_v6, %v1767_v18  ;;  %v1793_v7 = vrot.slane %v1792_v27, 4  ;;  %v1879_v46 = vmul.f32 32.0, %v2518_v49  ;;  %vm1883_vm10 = vweird.f32 %v2518_v49  ;;  %1943 = vmatpush.bf16.msra.mxu1 %v2297_v61  ;;  %v2302_v6 = vld [vmem:[%s3378_s12 + $0x18] sm:$0xff] }
 0x8e8   : > { %v1779_v30 = vperm.slane %v1775_v32, %v1727_v37  ;;  %2020 = vmatpush.bf16.msra.mxu2 %v2305_v0 }
 0x8e9   : > { %v1794_v24 = vsel %vm1721_vm5, %v1793_v7, %v1786_v21  ;;  %v1880_v50 = vsub.f32 1.0, %v1879_v46  ;;  %v2301_v21 = vld [vmem:[%s3378_s12 + $0x10] sm:$0xff] }
 0x8ea   : > { %v1798_v9 = vperm.slane %v1794_v24, %v1727_v37  ;;  %v1780_v10 = vrot.slane %v1779_v30, 4  ;;  %v1804_v11 = vshrl.u32 %v1779_v30, 16  ;;  %v2505_v24 = vld [vmem:[%s3416_s13] ss:$0 sm:$0xff] }
 0x8eb   : > { %v1881_v51 = vmul.f32 %v2518_v49, %v1880_v50 }
 0x8ec   : > { %v1805_v12 = vshrl.u32 %v1798_v9, 16  ;;  %v1781_v13 = vsel %vm1721_vm5, 0, %v1780_v10  ;;  %v1799_v14 = vrot.slane %v1798_v9, 4  ;;  %v1803_v15 = vpack.i.b16 %v1798_v9, %v1779_v30  ;;  %2021 = vmatpush.bf16.msra.mxu2 %v2304_v2 }
 0x8ed   : > { %v1810_v17 = vshrl.u32 %v1781_v13, 16  ;;  %v1882_v52 = vadd.f32 %v2518_v49, %v1881_v51 }
 0x8ee   : > { %v1806_v5 = vpack.i.b16 %v1805_v12, %v1804_v11  ;;  %v1800_v16 = vsel %vm1721_vm5, 0, %v1799_v14  ;;  %v2506_v11 = vld [vmem:[%s3417_s26] ss:$0 sm:$0xff] }
 0x8ef   : > { %v1811_v28 = vshrl.u32 %v1800_v16, 16  ;;  %v1809_v22 = vpack.i.b16 %v1800_v16, %v1781_v13  ;;  %v1884_v53 = vsel %vm1883_vm10, %v2518_v49, %v1882_v52  ;;  %v2507_v16 = vld [vmem:[%s3418_s27] ss:$0 sm:$0xff] }
 0x8f0   : > { %v1813_v20 = vunpack.c.l.b16 %v1806_v5  ;;  %2022 = vmatpush.bf16.msra.mxu2 %v2303_v3  ;;  %v2299_v5 = vld [vmem:[%s3378_s12] sm:$0xff] }
 0x8f1   : > { %v1812_v29 = vpack.i.b16 %v1811_v28, %v1810_v17  ;;  %v1817_v8 = vunpack.c.l.b16 %v1809_v22 }
 0x8f2   : > { %v1814_v19 = vpack.c.b16 %v1813_v20, %v1813_v20 }
 0x8f3   : > { %v1821_v23 = vunpack.c.l.b16 %v1812_v29  ;;  %v1818_v26 = vpack.c.b16 %v1817_v8, %v1817_v8 }
 0x8f4   : > { %1815 = vrot.lane.b32.xlu2 %v1814_v19, %s2757_s16  ;;  %2023 = vmatpush.bf16.msra.mxu2 %v2302_v6 }
 0x8f5   : > { %v1822_v25 = vpack.c.b16 %v1821_v23, %v1821_v23 }
 0x8f7   : > { %1823 = vrot.lane.b32.xlu0 %v1822_v25, %s2758_s24 }
 0x8f8   : > { %2024 = vmatpush.bf16.msra.mxu2 %v2301_v21 }
 0x8fc   : > { %1819 = vrot.lane.b32.xlu2 %v1818_v26, %s2759_s19  ;;  %s3419_s19 = sld [smem:[#allocation31_spill]] }
 0x902   : > { %v2508_v22 = vld [vmem:[%s3419_s19] ss:$0 sm:$0xff] }
 0x94e   : > { %v1816_v34 = vpop.permute.xlu2 %1815 }
 0x94f   : > { %v1828_v36 = vsel %vm1825_vm6, %v1803_v15, %v1816_v34  ;;  %v2300_v15 = vld [vmem:[%s3378_s12 + $0x8] sm:$0xff] }
 0x950   : > { %2025 = vmatpush.bf16.msra.mxu2 %v2300_v15 }
 0x954   : > { %2026 = vmatpush.bf16.msra.mxu2 %v2299_v5 }
 0x956   : > { %v1820_v35 = vpop.permute.xlu2 %1819 }
 0x957   : > { %v1831_v37 = vsel %vm1829_vm7, %v1828_v36, %v1820_v35 }
 0x969   : > { %v1824_v38 = vpop.permute.xlu0 %1823 }
 0x96a   : > { %v1834_v40 = vsel %vm1832_vm8, %v1831_v37, %v1824_v38 }
 0x96b   : > { %2244 = vmatmul.msk.bf16.vlgmr.msra.gmra.mxu0 %vm1855_vm9, %v1834_v40 }
 0x9e8   : > { %v1867_v41 = vpop.f32.mrf.mxu0 }
 0x9e9   : > { %v1868_v44 = vadd.f32 %v2504_v39, %v1867_v41 }
 0x9eb   : > { %v3266_v45 = vadd.f32 %v1871_v43, %v1868_v44 }
 0x9ed   : > { %v1875_v47 = vsel %vm1855_vm9, %v3266_v45, 0.0 }
 0x9ee   : > { %1876 = vadd.xlane.f32.xlu1 %v1875_v47 }
 0x9f0   : > { %v1869_v42 = vpop.f32.mrf.mxu0 }
 0xa61   : > { %v1877_v55 = vpop.xlane.xlu1 %1876 }
 0xa62   : > { %v1885_v54 = vmul.f32 %v1884_v53, %v1877_v55 }
 0xa64   : > { %v1886_v56 = vsub.f32 %v3266_v45, %v1885_v54 }
 0xa66   : > { %v1887_v58 = vmul.f32 %v1886_v56, %v1886_v56 }
 0xa68   : > { %v1888_v59 = vsel %vm1855_vm9, %v1887_v58, 0.0 }
 0xa69   : > { %1889 = vadd.xlane.f32.xlu2 %v1888_v59 }
 0xadc   : > { %v1890_v63 = vpop.xlane.xlu2 %1889 }
 0xadd   : > { %v1891_v57 = vmul.f32 %v1890_v63, %v1884_v53 }
 0xadf   : > { %v1892_v1 = vadd.f32 1e-05, %v1891_v57 }
 0xae1   : > { %2519 = vrsqrt.f32 %v1892_v1  ;;  %vm1899_vm12 = vweird.f32 %v1892_v1 }
 0xae7   : > { %v2520_v4 = vpop.eup %2519 }
 0xae8   : > { %v1894_v18 = vmul.f32 %v2520_v4, %v1892_v1  ;;  %vm1900_vm11 = vweird.f32 %v2520_v4 }
 0xae9   : > { %vm1901_vm13 = vmor %vm1899_vm12, %vm1900_vm11 }
 0xaea   : > { %v1895_v27 = vmul.f32 %v2520_v4, %v1894_v18 }
 0xaec   : > { %v1896_v32 = vmul.f32 0.5, %v1895_v27 }
 0xaee   : > { %v1897_v7 = vsub.f32 1.5, %v1896_v32 }
 0xaf0   : > { %v1898_v30 = vmul.f32 %v2520_v4, %v1897_v7 }
 0xaf2   : > { %v1902_v9 = vsel %vm1901_vm13, %v2520_v4, %v1898_v30 }
 0xaf3   : > { %v1903_v10 = vmul.f32 %v1902_v9, %v1886_v56 }
 0xaf5   : > { %v1907_v12 = vmul.f32 %v2505_v24, %v1903_v10 }
 0xaf7   : > { %v1911_v13 = vadd.f32 %v2506_v11, %v1907_v12 }
 0xaf9   : > { %v1912_v14 = vpack.c.bf16 %v1911_v13, %v1911_v13 }
 0xafb   : > { %2253 = vmatmul.msk.bf16.vlgmr.msra.gmra.mxu1 %vm1855_vm9, %v1912_v14 }
 0xb78   : > { %v1945_v17 = vpop.f32.mrf.mxu1 }
 0xb79   : > { %v1946_v28 = vadd.f32 %v2507_v16, %v1945_v17 }
 0xb7b   : > { %v1949_v20 = vmax.f32 %v1946_v28, 0.0 }
 0xb7d   : > { %v1950_v29 = vpack.c.bf16 %v1949_v20, %v1949_v20 }
 0xb7f   : > { %2027 = vmatmul.bf16.vlgmr.msra.gmra.mxu2 %v1950_v29 }
 0xb80   : > { %v1947_v19 = vpop.f32.mrf.mxu1 }
 0xc02   : > { %v2028_v23 = vpop.f32.mrf.mxu2 }
 0xc03   : > { %v2029_v25 = vadd.f32 %v2508_v22, %v2028_v23 }
 0xc05   : > { %v2032_v8 = vadd.f32 %v2029_v25, %v3266_v45 }
 0xc07   : > { %2033 = vst.msk [vmem:[%s562_s11] sm:$0xff] %vm1855_vm9, %v2032_v8 }
 0xc0a   : > { %v2030_v26 = vpop.f32.mrf.mxu2 }
 0xc0b PF: > { %s2287_s13 = sshll.u32 %s2713_s18, 1  ;;  %s2049_s29 = sshll.u32 %s562_s11, 4  ;;  %s2050_s29 = int_to_ptr.vmem [resolvable:$true] %s2049_s29 }
 0xc0c   : > { %s2045_s23 = sadd.s32 %s2709_s17, %s2287_s13  ;;  %s3421_s14 = sld [smem:[#allocation32_spill]] }
 0xc0d   : > { %s2288_s26 = sshll.u32 %s2045_s23, 3  ;;  %s2035_s25 = scalar_lea.sflag [#allocation8], %s560_s6 }
 0xc12   : > { %s2047_s21 = scalar_lea.hbm %s3421_s14, %s2288_s26  ;;  %s2631_s8 = scalar_lea.hbm %s3421_s14, 32 }
 0xc13   : > { %s2051_s22 = sshll.u32 %s2047_s21, 4  ;;  %s2052_s22 = int_to_ptr.hbm [resolvable:$true] %s2051_s22 }
 0xc14   : > { %s2625_s27 = sshra.s32 %s2052_s22, 4  ;;  %s2626_s27 = int_to_ptr.hbm [resolvable:$true] %s2625_s27 }
 0xc15   : > { %s2627_s16 = scalar_lea.hbm %s2626_s27, 8  ;;  %p2632_p1 = scmp.lt.s32.totalorder %s2626_s27, %s3421_s14 }
 0xc16   : > { %p2628_p12 = scmp.ne.s32.totalorder %s2626_s27, %s2627_s16  ;;  %p2633_p2 = scmp.lt.s32.totalorder %s2631_s8, %s2627_s16 }
 0xc18   : > { %p2629_p13 = pnand %p2628_p12, %p2899_p6  ;;  %p2634_p3 = por %p2633_p2, %p2632_p1 }
 0xc1a   : > { %p2630_p0 = pneg %p2629_p13 }
 0xc1c   : > { %p2635_p4 = pnand %p2634_p3, %p2630_p0 }
 0xc1e   : > { %2638 = shalt.err (!%p2635_p4)
}
 0xc1f   : > { %2319 = dma.vmem_to_hbm [thread:$0]  (%p2899_p6), %s2050_s29, 128, %s2052_s22, %s2035_s25  }
 0xc20 PF: > { %s3422_s6 = sld [smem:[#allocation20_spill]] }
 0xc21   : > { %s3423_s19 = sld [smem:[#allocation16_spill]] }
 0xc26   : > { %p2341_p5 = scmp.ge.s32.totalorder %s3422_s6, 2 }
 0xc27   : > { %s2063_s23 = sand.u32 1, %s3423_s19  }
 0xc28   : > { %p2332_p7 = pnand %p2341_p5, %p2909_p8  ;;  %s2064_s26 = scalar_lea.sflag [#allocation8], %s2063_s23 }
 0xc2a   : > { %p2333_p9 = pneg %p2332_p7 }
 0xc2c   : > { %2688 = dma.done.wait (%p2333_p9), %s2064_s26, 128  }
 0xc2d   : > { %2690 = vsyncadd (%p2333_p9), %s2064_s26, 4294967168  ;;  %s29_s22 = sadd.s32 1, %s3422_s6   ;;  %s3425_s28 = sld [smem:[#allocation26_spill]] }
 0xc2e   : > { %p26_p10 = scmp.ge.s32.totalorder %s29_s22, 10   ;;  %s3426_s16 = sld [smem:[#allocation17_spill]] }
 0xc2f   : > { %s3427_s17 = sld [smem:[#allocation18_spill]]  ;;  %s3432_s29 = smov %s2697_s30 }
 0xc30   : > { %s3428_s18 = sld [smem:[#allocation19_spill]]  ;;  %s3433_s30 = smov %s2701_s15 }
 0xc31   : > { %s3429_s19 = sld [smem:[#allocation21_spill]]  ;;  %28 = sbr.rel (!%p26_p10) target bundleno = 15 (0xf), region = 147 }
 0xc32   : > { %s3430_s20 = sld [smem:[#allocation23_spill]] }
 0xc33   : > { %s3431_s21 = sld [smem:[#allocation25_spill]]  ;;  %s3434_s15 = smov %s3425_s28 }
 0xc36   :  { %2070 = vsyncpa [#allocation7], 1 }
 0xc37   :  { %2072 = vsyncpa [#allocation7 + $0x1], 1 }
 0xc38   :  { %2073 = vsyncpa [#allocation10], 1 }
 0xc39   :  { %2074 = vsyncpa [#allocation8], 1 }
 0xc3a   :  { %2076 = vsyncpa [#allocation8 + $0x1], 1 }

</bundles_post_ra>
